<compile_context>
chip_gen: v5e
topology: v5e:2x2
jax: 0.10.0
libtpu: 0.0.40
codegen_flags: <defaults>
</compile_context>

<pallas_src>
import math

import jax
import jax.numpy as jnp
from jax import lax
from jax.experimental import pallas as pl
from jax.experimental.pallas import tpu as pltpu


# -----------------------------------------------------------------------------
# Pallas kernels
# -----------------------------------------------------------------------------
def conv_relu_pool_kernel(p_ref, w_ref, b_ref, o_ref, acc_ref):
    """Fused conv (im2col matmul) + bias + ReLU + 2x2 max-pool.

    Grid = (image_blocks, 4 pool slots); slot axis is the reduction axis.
      p_ref:   (1, B*P, K)   bf16 patches of one pool slot for B images.
      w_ref:   (K, Cout)     bf16 conv weight as matmul operand.
      b_ref:   (1, Cout)     f32 bias.
      o_ref:   (B*P, Cout)   bf16 pooled output (written at last slot).
      acc_ref: (B*P, Cout)   f32 running max accumulator (VMEM scratch).
    """
    s = pl.program_id(1)
    h = jnp.dot(p_ref[0], w_ref[...], preferred_element_type=jnp.float32)

    @pl.when(s == 0)
    def _():
        acc_ref[...] = h

    @pl.when(s != 0)
    def _():
        acc_ref[...] = jnp.maximum(acc_ref[...], h)

    @pl.when(s == pl.num_programs(1) - 1)
    def _():
        # bias + ReLU hoisted after the slot max (exactly equivalent).
        o_ref[...] = jnp.maximum(acc_ref[...] + b_ref[...], 0.0).astype(o_ref.dtype)


def mlp_kernel(x_ref, w1_ref, b1_ref, w2_ref, b2_ref, o_ref):
    """fc1 (bf16 x bf16 -> f32) + ReLU + fc2 (f32) for one batch tile."""
    h = jnp.dot(x_ref[...], w1_ref[...], preferred_element_type=jnp.float32) + b1_ref[...]
    h = jnp.maximum(h, 0.0)
    o = jnp.dot(h, w2_ref[...], preferred_element_type=jnp.float32) + b2_ref[...]
    o_ref[...] = o.astype(o_ref.dtype)


# -----------------------------------------------------------------------------
# pallas_call wrappers
# -----------------------------------------------------------------------------
def conv_relu_pool(patches, w_mat, b_row, block_rows):
    """patches: (4, N*P, K) bf16; returns pooled conv output (N*P, Cout) bf16."""
    S, R, K = patches.shape
    cout = w_mat.shape[1]
    assert R % block_rows == 0
    grid = (R // block_rows, S)  # image blocks (parallel) x pool slots (reduction)
    return pl.pallas_call(
        conv_relu_pool_kernel,
        out_shape=jax.ShapeDtypeStruct((R, cout), jnp.bfloat16),
        grid=grid,
        in_specs=[
            pl.BlockSpec((1, block_rows, K), lambda i, s: (s, i, 0)),
            pl.BlockSpec((K, cout), lambda i, s: (0, 0)),
            pl.BlockSpec((1, cout), lambda i, s: (0, 0)),
        ],
        out_specs=pl.BlockSpec((block_rows, cout), lambda i, s: (i, 0)),
        scratch_shapes=[pltpu.VMEM((block_rows, cout), jnp.float32)],
        compiler_params=pltpu.CompilerParams(
            dimension_semantics=("parallel", "arbitrary")),
    )(patches, w_mat, b_row)


def mlp(x, w1, b1, w2, b2):
    """Batch-tiled fc1+ReLU+fc2; weights are full-extent (resident) blocks."""
    N, D = x.shape
    H = w1.shape[1]
    O = w2.shape[1]
    tb = 128 if (N > 128 and N % 128 == 0) else N   # single block at small batch
    return pl.pallas_call(
        mlp_kernel,
        out_shape=jax.ShapeDtypeStruct((N, O), jnp.float32),
        grid=(N // tb,),
        in_specs=[
            pl.BlockSpec((tb, D), lambda i: (i, 0)),
            pl.BlockSpec((D, H), lambda i: (0, 0)),
            pl.BlockSpec((1, H), lambda i: (0, 0)),
            pl.BlockSpec((H, O), lambda i: (0, 0)),
            pl.BlockSpec((1, O), lambda i: (0, 0)),
        ],
        out_specs=pl.BlockSpec((tb, O), lambda i: (i, 0)),
        compiler_params=pltpu.CompilerParams(dimension_semantics=("parallel",)),
    )(x, w1, b1, w2, b2)


# -----------------------------------------------------------------------------
# JAX glue: slot-major im2col (pure data plumbing, no compute)
# -----------------------------------------------------------------------------
def _im2col_slotmajor(x_nhwc):
    """(N,H,W,C) -> (4, N*(H//2)*(W//2), 9*C) patches for a 3x3/pad=1 conv,
    grouped so pool slot s = 2*py+px is the OUTERMOST axis (contiguous slabs).
    Row order within a slot: (n, i, j) pooled cell; col order: (dy, dx, c)."""
    N, H, W, C = x_nhwc.shape
    Hp, Wp = H // 2, W // 2
    xp = jnp.pad(x_nhwc, ((0, 0), (1, 1), (1, 1), (0, 0)))
    slots = []
    for py in range(2):
        for px in range(2):
            taps = [xp[:, py + dy: py + dy + H: 2, px + dx: px + dx + W: 2, :]
                    for dy in range(3) for dx in range(3)]        # each (N,Hp,Wp,C)
            s = jnp.stack(taps, axis=3)                           # (N,Hp,Wp,9,C)
            slots.append(s.reshape(N * Hp * Wp, 9 * C))
    return jnp.stack(slots, axis=0)                               # (4, N*Hp*Wp, 9C)


def _conv_weight_to_mat(w_oihw):
    """(Cout, Cin, 3, 3) -> (9*Cin, Cout), rows ordered (dy, dx, cin)."""
    cout, cin = w_oihw.shape[0], w_oihw.shape[1]
    return jnp.transpose(w_oihw, (2, 3, 1, 0)).reshape(9 * cin, cout)


def prepare_params(params):
    """One-time parameter re-layout (hoisted out of the forward pass)."""
    bf = jnp.bfloat16
    # fc1 weight rows permuted from NCHW flatten order (c*49+i*7+j) to NHWC
    # flatten order ((i*7+j)*64+c) so no runtime transpose of y2 is needed.
    fc1_nhwc = (params["fc1_w"].reshape(128, 64, 7, 7)
                .transpose(2, 3, 1, 0).reshape(49 * 64, 128))
    return {
        "conv1_w": _conv_weight_to_mat(params["conv1_w"]).astype(bf),
        "conv1_b": params["conv1_b"].reshape(1, -1).astype(jnp.float32),
        "conv2_w": _conv_weight_to_mat(params["conv2_w"]).astype(bf),
        "conv2_b": params["conv2_b"].reshape(1, -1).astype(jnp.float32),
        "fc1_w": fc1_nhwc.astype(bf),
        "fc1_b": params["fc1_b"].reshape(1, -1).astype(jnp.float32),
        "fc2_w": params["fc2_w"].T.astype(jnp.float32),
        "fc2_b": params["fc2_b"].reshape(1, -1).astype(jnp.float32),
    }


def _pick_image_block(n):
    # B images per conv grid step.  B=16 keeps B*P sublane-aligned (bf16) for
    # both conv layers and gives >=2 grid steps (megacore) at larger batches;
    # B == n (single block, full-extent dims) is always legal.
    if n > 16 and n % 16 == 0:
        return 16
    return n


def better_fashion_classifier(x_nchw, prep):
    """Pallas forward pass matching BetterFashionClassifier semantics."""
    N = x_nchw.shape[0]
    B = _pick_image_block(N)
    x = jnp.transpose(x_nchw, (0, 2, 3, 1)).astype(jnp.bfloat16)      # NHWC bf16

    # conv1 -> relu -> maxpool(2,2)
    p1 = _im2col_slotmajor(x)                                         # (4, N*196, 9)
    y1 = conv_relu_pool(p1, prep["conv1_w"], prep["conv1_b"], B * 196)  # (N*196, 32)
    y1 = y1.reshape(N, 14, 14, 32)

    # conv2 -> relu -> maxpool(2,2)
    p2 = _im2col_slotmajor(y1)                                        # (4, N*49, 288)
    y2 = conv_relu_pool(p2, prep["conv2_w"], prep["conv2_b"], B * 49)   # (N*49, 64)

    # NHWC flatten (free reshape; fc1 weight rows were permuted to match).
    f = y2.reshape(N, 49 * 64)

    # fc1 -> relu -> fc2
    return mlp(f, prep["fc1_w"], prep["fc1_b"], prep["fc2_w"], prep["fc2_b"])


# -----------------------------------------------------------------------------
# Deterministic parameter init (PyTorch default-style uniform(-1/sqrt(fan_in), .))
# -----------------------------------------------------------------------------
def init_params(key):
    ks = jax.random.split(key, 8)

    def u(k, shape, fan_in):
        bound = 1.0 / math.sqrt(fan_in)
        return jax.random.uniform(k, shape, jnp.float32, -bound, bound)

    return {
        "conv1_w": u(ks[0], (32, 1, 3, 3), 1 * 9),
        "conv1_b": u(ks[1], (32,), 1 * 9),
        "conv2_w": u(ks[2], (64, 32, 3, 3), 32 * 9),
        "conv2_b": u(ks[3], (64,), 32 * 9),
        "fc1_w": u(ks[4], (128, 64 * 7 * 7), 64 * 7 * 7),
        "fc1_b": u(ks[5], (128,), 64 * 7 * 7),
        "fc2_w": u(ks[6], (10, 128), 128),
        "fc2_b": u(ks[7], (10,), 128),
    }


# -----------------------------------------------------------------------------
# Plain-JAX reference (uses the ORIGINAL PyTorch-layout params and NCHW flatten;
# MXU operands quantized to bf16 exactly like the kernel path, f32 accumulation)
# -----------------------------------------------------------------------------
def reference_forward(x_nchw, params):
    bf = jnp.bfloat16
    N = x_nchw.shape[0]

    def conv_relu(x, w, b):
        y = lax.conv_general_dilated(
            x.astype(bf), w.astype(bf), (1, 1), ((1, 1), (1, 1)),
            dimension_numbers=("NCHW", "OIHW", "NCHW"),
            preferred_element_type=jnp.float32)
        return jnp.maximum(y + b[None, :, None, None], 0.0)

    def pool(x):
        n, c, h, w = x.shape
        return x.reshape(n, c, h // 2, 2, w // 2, 2).max(axis=(3, 5))

    y1 = pool(conv_relu(x_nchw, params["conv1_w"], params["conv1_b"]))          # f32
    y2 = pool(conv_relu(y1.astype(bf), params["conv2_w"], params["conv2_b"]))   # f32
    f = y2.astype(bf).reshape(N, -1)                                            # NCHW flatten
    h = jnp.dot(f, params["fc1_w"].astype(bf).T,
                preferred_element_type=jnp.float32) + params["fc1_b"]
    h = jnp.maximum(h, 0.0)
    return h @ params["fc2_w"].T + params["fc2_b"]


if __name__ == "__main__":
    key = jax.random.PRNGKey(0)
    k_x, k_p = jax.random.split(key)
    params = init_params(k_p)
    prep = prepare_params(params)
    # Fashion-MNIST style input implied by fc1 = Linear(64*7*7, 128): 28x28x1.
    x = jax.random.normal(k_x, (2, 1, 28, 28), jnp.float32)

    fwd = jax.jit(better_fashion_classifier)
    logits = jax.block_until_ready(fwd(x, prep))
    assert logits.shape == (2, 10), logits.shape

    ref = jax.block_until_ready(reference_forward(x, params))
    max_err = float(jnp.max(jnp.abs(logits - ref)))
    assert jnp.allclose(logits, ref, rtol=1e-2, atol=1e-2), max_err

    print("KERNEL_OK")
</pallas_src>

<mosaic_0001>
module attributes {stable_mosaic.version = 11 : i64} {
  func.func @conv_relu_pool_kernel(%arg0: i32, %arg1: i32, %arg2: memref<1x392x9xbf16, #tpu.memory_space<vmem>>, %arg3: memref<9x32xbf16, #tpu.memory_space<vmem>>, %arg4: memref<1x32xf32, #tpu.memory_space<vmem>>, %arg5: memref<392x32xbf16, #tpu.memory_space<vmem>>, %arg6: memref<392x32xf32, #tpu.memory_space<vmem>>) attributes {dimension_semantics = [#tpu.dimension_semantics<parallel>, #tpu.dimension_semantics<arbitrary>], iteration_bounds = array<i64: 1, 4>, scalar_prefetch = 0 : i64, scratch_operands = 1 : i64, tpu.core_type = #tpu.core_type<tc>, window_params = [{transform_indices = @transform_0, window_bounds = array<i64: 1, 392, 9>}, {pipeline_mode = #tpu.pipeline_mode<synchronous>, transform_indices = @transform_1, window_bounds = array<i64: 9, 32>}, {pipeline_mode = #tpu.pipeline_mode<synchronous>, transform_indices = @transform_2, window_bounds = array<i64: 1, 32>}, {transform_indices = @transform_3, window_bounds = array<i64: 392, 32>}]} {
    %c0 = arith.constant 0 : index
    %c0_0 = arith.constant 0 : index
    %c0_1 = arith.constant 0 : index
    %0 = vector.load %arg2[%c0, %c0_0, %c0_1] : memref<1x392x9xbf16, #tpu.memory_space<vmem>>, vector<1x392x9xbf16>
    %1 = vector.shape_cast %0 : vector<1x392x9xbf16> to vector<392x9xbf16>
    %c0_2 = arith.constant 0 : index
    %c0_3 = arith.constant 0 : index
    %2 = vector.load %arg3[%c0_2, %c0_3] : memref<9x32xbf16, #tpu.memory_space<vmem>>, vector<9x32xbf16>
    %cst = arith.constant dense<0.000000e+00> : vector<392x32xf32>
    %3 = tpu.matmul %1, %2, %cst {dimension_numbers = #tpu.dot_dimension_numbers<[1], [0], [0], [1], [0, 0, 1, 1], [], []>} : vector<392x9xbf16>, vector<9x32xbf16>, vector<392x32xf32> -> vector<392x32xf32>
    %c0_i32 = arith.constant 0 : i32
    %4 = arith.cmpi eq, %arg1, %c0_i32 : i32
    %5 = arith.extui %4 : i1 to i32
    %c0_i32_4 = arith.constant 0 : i32
    %6 = arith.cmpi ne, %5, %c0_i32_4 : i32
    scf.if %6 {
      %c0_8 = arith.constant 0 : index
      %c0_9 = arith.constant 0 : index
      %13 = vector.load %arg6[%c0_8, %c0_9] : memref<392x32xf32, #tpu.memory_space<vmem>>, vector<392x32xf32>
      tpu.vector_store %arg6[%c0_8, %c0_9], %3 {strides = array<i32>} : memref<392x32xf32, #tpu.memory_space<vmem>>, vector<392x32xf32>,
    } else {
    }
    %c0_i32_5 = arith.constant 0 : i32
    %7 = arith.cmpi ne, %arg1, %c0_i32_5 : i32
    %8 = arith.extui %7 : i1 to i32
    %c0_i32_6 = arith.constant 0 : i32
    %9 = arith.cmpi ne, %8, %c0_i32_6 : i32
    scf.if %9 {
      %c0_8 = arith.constant 0 : index
      %c0_9 = arith.constant 0 : index
      %13 = vector.load %arg6[%c0_8, %c0_9] : memref<392x32xf32, #tpu.memory_space<vmem>>, vector<392x32xf32>
      %14 = arith.maximumf %13, %3 : vector<392x32xf32>
      %c0_10 = arith.constant 0 : index
      %c0_11 = arith.constant 0 : index
      %15 = vector.load %arg6[%c0_10, %c0_11] : memref<392x32xf32, #tpu.memory_space<vmem>>, vector<392x32xf32>
      tpu.vector_store %arg6[%c0_10, %c0_11], %14 {strides = array<i32>} : memref<392x32xf32, #tpu.memory_space<vmem>>, vector<392x32xf32>,
    } else {
    }
    %c3_i32 = arith.constant 3 : i32
    %10 = arith.cmpi eq, %arg1, %c3_i32 : i32
    %11 = arith.extui %10 : i1 to i32
    %c0_i32_7 = arith.constant 0 : i32
    %12 = arith.cmpi ne, %11, %c0_i32_7 : i32
    scf.if %12 {
      %c0_8 = arith.constant 0 : index
      %c0_9 = arith.constant 0 : index
      %13 = vector.load %arg6[%c0_8, %c0_9] : memref<392x32xf32, #tpu.memory_space<vmem>>, vector<392x32xf32>
      %c0_10 = arith.constant 0 : index
      %c0_11 = arith.constant 0 : index
      %14 = vector.load %arg4[%c0_10, %c0_11] : memref<1x32xf32, #tpu.memory_space<vmem>>, vector<1x32xf32>
      %15 = vector.broadcast %14 : vector<1x32xf32> to vector<392x32xf32>
      %16 = arith.addf %13, %15 : vector<392x32xf32>
      %cst_12 = arith.constant 0.000000e+00 : f32
      %17 = vector.broadcast %cst_12 : f32 to vector<392x32xf32>
      %18 = arith.maximumf %16, %17 : vector<392x32xf32>
      %19 = arith.truncf %18 : vector<392x32xf32> to vector<392x32xbf16>
      %c0_13 = arith.constant 0 : index
      %c0_14 = arith.constant 0 : index
      %20 = vector.load %arg5[%c0_13, %c0_14] : memref<392x32xbf16, #tpu.memory_space<vmem>>, vector<392x32xbf16>
      tpu.vector_store %arg5[%c0_13, %c0_14], %19 {strides = array<i32>} : memref<392x32xbf16, #tpu.memory_space<vmem>>, vector<392x32xbf16>,
    } else {
    }
    return
  }
  func.func @transform_0(%arg0: i32, %arg1: i32) -> (i32, i32, i32) {
    %c0_i32 = arith.constant 0 : i32
    %c0_i32_0 = arith.constant 0 : i32
    return %arg1, %arg0, %c0_i32 : i32, i32, i32
  }
  func.func @transform_1(%arg0: i32, %arg1: i32) -> (i32, i32) {
    %c0_i32 = arith.constant 0 : i32
    %c0_i32_0 = arith.constant 0 : i32
    %c0_i32_1 = arith.constant 0 : i32
    return %c0_i32, %c0_i32_0 : i32, i32
  }
  func.func @transform_2(%arg0: i32, %arg1: i32) -> (i32, i32) {
    %c0_i32 = arith.constant 0 : i32
    %c0_i32_0 = arith.constant 0 : i32
    %c0_i32_1 = arith.constant 0 : i32
    return %c0_i32, %c0_i32_0 : i32, i32
  }
  func.func @transform_3(%arg0: i32, %arg1: i32) -> (i32, i32) {
    %c0_i32 = arith.constant 0 : i32
    %c0_i32_0 = arith.constant 0 : i32
    return %arg0, %c0_i32 : i32, i32
  }
}

module attributes {stable_mosaic.version = 11 : i64} {
  func.func @conv_relu_pool_kernel(%arg0: i32, %arg1: i32, %arg2: memref<1x98x288xbf16, #tpu.memory_space<vmem>>, %arg3: memref<288x64xbf16, #tpu.memory_space<vmem>>, %arg4: memref<1x64xf32, #tpu.memory_space<vmem>>, %arg5: memref<98x64xbf16, #tpu.memory_space<vmem>>, %arg6: memref<98x64xf32, #tpu.memory_space<vmem>>) attributes {dimension_semantics = [#tpu.dimension_semantics<parallel>, #tpu.dimension_semantics<arbitrary>], iteration_bounds = array<i64: 1, 4>, scalar_prefetch = 0 : i64, scratch_operands = 1 : i64, tpu.core_type = #tpu.core_type<tc>, window_params = [{transform_indices = @transform_0, window_bounds = array<i64: 1, 98, 288>}, {pipeline_mode = #tpu.pipeline_mode<synchronous>, transform_indices = @transform_1, window_bounds = array<i64: 288, 64>}, {pipeline_mode = #tpu.pipeline_mode<synchronous>, transform_indices = @transform_2, window_bounds = array<i64: 1, 64>}, {transform_indices = @transform_3, window_bounds = array<i64: 98, 64>}]} {
    %c0 = arith.constant 0 : index
    %c0_0 = arith.constant 0 : index
    %c0_1 = arith.constant 0 : index
    %0 = vector.load %arg2[%c0, %c0_0, %c0_1] : memref<1x98x288xbf16, #tpu.memory_space<vmem>>, vector<1x98x288xbf16>
    %1 = vector.shape_cast %0 : vector<1x98x288xbf16> to vector<98x288xbf16>
    %c0_2 = arith.constant 0 : index
    %c0_3 = arith.constant 0 : index
    %2 = vector.load %arg3[%c0_2, %c0_3] : memref<288x64xbf16, #tpu.memory_space<vmem>>, vector<288x64xbf16>
    %cst = arith.constant dense<0.000000e+00> : vector<98x64xf32>
    %3 = tpu.matmul %1, %2, %cst {dimension_numbers = #tpu.dot_dimension_numbers<[1], [0], [0], [1], [0, 0, 1, 1], [], []>} : vector<98x288xbf16>, vector<288x64xbf16>, vector<98x64xf32> -> vector<98x64xf32>
    %c0_i32 = arith.constant 0 : i32
    %4 = arith.cmpi eq, %arg1, %c0_i32 : i32
    %5 = arith.extui %4 : i1 to i32
    %c0_i32_4 = arith.constant 0 : i32
    %6 = arith.cmpi ne, %5, %c0_i32_4 : i32
    scf.if %6 {
      %c0_8 = arith.constant 0 : index
      %c0_9 = arith.constant 0 : index
      %13 = vector.load %arg6[%c0_8, %c0_9] : memref<98x64xf32, #tpu.memory_space<vmem>>, vector<98x64xf32>
      tpu.vector_store %arg6[%c0_8, %c0_9], %3 {strides = array<i32>} : memref<98x64xf32, #tpu.memory_space<vmem>>, vector<98x64xf32>,
    } else {
    }
    %c0_i32_5 = arith.constant 0 : i32
    %7 = arith.cmpi ne, %arg1, %c0_i32_5 : i32
    %8 = arith.extui %7 : i1 to i32
    %c0_i32_6 = arith.constant 0 : i32
    %9 = arith.cmpi ne, %8, %c0_i32_6 : i32
    scf.if %9 {
      %c0_8 = arith.constant 0 : index
      %c0_9 = arith.constant 0 : index
      %13 = vector.load %arg6[%c0_8, %c0_9] : memref<98x64xf32, #tpu.memory_space<vmem>>, vector<98x64xf32>
      %14 = arith.maximumf %13, %3 : vector<98x64xf32>
      %c0_10 = arith.constant 0 : index
      %c0_11 = arith.constant 0 : index
      %15 = vector.load %arg6[%c0_10, %c0_11] : memref<98x64xf32, #tpu.memory_space<vmem>>, vector<98x64xf32>
      tpu.vector_store %arg6[%c0_10, %c0_11], %14 {strides = array<i32>} : memref<98x64xf32, #tpu.memory_space<vmem>>, vector<98x64xf32>,
    } else {
    }
    %c3_i32 = arith.constant 3 : i32
    %10 = arith.cmpi eq, %arg1, %c3_i32 : i32
    %11 = arith.extui %10 : i1 to i32
    %c0_i32_7 = arith.constant 0 : i32
    %12 = arith.cmpi ne, %11, %c0_i32_7 : i32
    scf.if %12 {
      %c0_8 = arith.constant 0 : index
      %c0_9 = arith.constant 0 : index
      %13 = vector.load %arg6[%c0_8, %c0_9] : memref<98x64xf32, #tpu.memory_space<vmem>>, vector<98x64xf32>
      %c0_10 = arith.constant 0 : index
      %c0_11 = arith.constant 0 : index
      %14 = vector.load %arg4[%c0_10, %c0_11] : memref<1x64xf32, #tpu.memory_space<vmem>>, vector<1x64xf32>
      %15 = vector.broadcast %14 : vector<1x64xf32> to vector<98x64xf32>
      %16 = arith.addf %13, %15 : vector<98x64xf32>
      %cst_12 = arith.constant 0.000000e+00 : f32
      %17 = vector.broadcast %cst_12 : f32 to vector<98x64xf32>
      %18 = arith.maximumf %16, %17 : vector<98x64xf32>
      %19 = arith.truncf %18 : vector<98x64xf32> to vector<98x64xbf16>
      %c0_13 = arith.constant 0 : index
      %c0_14 = arith.constant 0 : index
      %20 = vector.load %arg5[%c0_13, %c0_14] : memref<98x64xbf16, #tpu.memory_space<vmem>>, vector<98x64xbf16>
      tpu.vector_store %arg5[%c0_13, %c0_14], %19 {strides = array<i32>} : memref<98x64xbf16, #tpu.memory_space<vmem>>, vector<98x64xbf16>,
    } else {
    }
    return
  }
  func.func @transform_0(%arg0: i32, %arg1: i32) -> (i32, i32, i32) {
    %c0_i32 = arith.constant 0 : i32
    %c0_i32_0 = arith.constant 0 : i32
    return %arg1, %arg0, %c0_i32 : i32, i32, i32
  }
  func.func @transform_1(%arg0: i32, %arg1: i32) -> (i32, i32) {
    %c0_i32 = arith.constant 0 : i32
    %c0_i32_0 = arith.constant 0 : i32
    %c0_i32_1 = arith.constant 0 : i32
    return %c0_i32, %c0_i32_0 : i32, i32
  }
  func.func @transform_2(%arg0: i32, %arg1: i32) -> (i32, i32) {
    %c0_i32 = arith.constant 0 : i32
    %c0_i32_0 = arith.constant 0 : i32
    %c0_i32_1 = arith.constant 0 : i32
    return %c0_i32, %c0_i32_0 : i32, i32
  }
  func.func @transform_3(%arg0: i32, %arg1: i32) -> (i32, i32) {
    %c0_i32 = arith.constant 0 : i32
    %c0_i32_0 = arith.constant 0 : i32
    return %arg0, %c0_i32 : i32, i32
  }
}

module attributes {stable_mosaic.version = 11 : i64} {
  func.func @mlp_kernel(%arg0: i32, %arg1: memref<2x3136xbf16, #tpu.memory_space<vmem>>, %arg2: memref<3136x128xbf16, #tpu.memory_space<vmem>>, %arg3: memref<1x128xf32, #tpu.memory_space<vmem>>, %arg4: memref<128x10xf32, #tpu.memory_space<vmem>>, %arg5: memref<1x10xf32, #tpu.memory_space<vmem>>, %arg6: memref<2x10xf32, #tpu.memory_space<vmem>>) attributes {dimension_semantics = [#tpu.dimension_semantics<parallel>], iteration_bounds = array<i64: 1>, scalar_prefetch = 0 : i64, scratch_operands = 0 : i64, tpu.core_type = #tpu.core_type<tc>, window_params = [{transform_indices = @transform_0, window_bounds = array<i64: 2, 3136>}, {pipeline_mode = #tpu.pipeline_mode<synchronous>, transform_indices = @transform_1, window_bounds = array<i64: 3136, 128>}, {pipeline_mode = #tpu.pipeline_mode<synchronous>, transform_indices = @transform_2, window_bounds = array<i64: 1, 128>}, {pipeline_mode = #tpu.pipeline_mode<synchronous>, transform_indices = @transform_3, window_bounds = array<i64: 128, 10>}, {pipeline_mode = #tpu.pipeline_mode<synchronous>, transform_indices = @transform_4, window_bounds = array<i64: 1, 10>}, {transform_indices = @transform_5, window_bounds = array<i64: 2, 10>}]} {
    %c0 = arith.constant 0 : index
    %c0_0 = arith.constant 0 : index
    %0 = vector.load %arg1[%c0, %c0_0] : memref<2x3136xbf16, #tpu.memory_space<vmem>>, vector<2x3136xbf16>
    %c0_1 = arith.constant 0 : index
    %c0_2 = arith.constant 0 : index
    %1 = vector.load %arg2[%c0_1, %c0_2] : memref<3136x128xbf16, #tpu.memory_space<vmem>>, vector<3136x128xbf16>
    %cst = arith.constant dense<0.000000e+00> : vector<2x128xf32>
    %2 = tpu.matmul %0, %1, %cst {dimension_numbers = #tpu.dot_dimension_numbers<[1], [0], [0], [1], [0, 0, 1, 1], [], []>} : vector<2x3136xbf16>, vector<3136x128xbf16>, vector<2x128xf32> -> vector<2x128xf32>
    %c0_3 = arith.constant 0 : index
    %c0_4 = arith.constant 0 : index
    %3 = vector.load %arg3[%c0_3, %c0_4] : memref<1x128xf32, #tpu.memory_space<vmem>>, vector<1x128xf32>
    %4 = vector.broadcast %3 : vector<1x128xf32> to vector<2x128xf32>
    %5 = arith.addf %2, %4 : vector<2x128xf32>
    %cst_5 = arith.constant 0.000000e+00 : f32
    %6 = vector.broadcast %cst_5 : f32 to vector<2x128xf32>
    %7 = arith.maximumf %5, %6 : vector<2x128xf32>
    %c0_6 = arith.constant 0 : index
    %c0_7 = arith.constant 0 : index
    %8 = vector.load %arg4[%c0_6, %c0_7] : memref<128x10xf32, #tpu.memory_space<vmem>>, vector<128x10xf32>
    %cst_8 = arith.constant dense<0.000000e+00> : vector<2x10xf32>
    %9 = tpu.matmul %7, %8, %cst_8 {dimension_numbers = #tpu.dot_dimension_numbers<[1], [0], [0], [1], [0, 0, 1, 1], [], []>} : vector<2x128xf32>, vector<128x10xf32>, vector<2x10xf32> -> vector<2x10xf32>
    %c0_9 = arith.constant 0 : index
    %c0_10 = arith.constant 0 : index
    %10 = vector.load %arg5[%c0_9, %c0_10] : memref<1x10xf32, #tpu.memory_space<vmem>>, vector<1x10xf32>
    %11 = vector.broadcast %10 : vector<1x10xf32> to vector<2x10xf32>
    %12 = arith.addf %9, %11 : vector<2x10xf32>
    %c0_11 = arith.constant 0 : index
    %c0_12 = arith.constant 0 : index
    %13 = vector.load %arg6[%c0_11, %c0_12] : memref<2x10xf32, #tpu.memory_space<vmem>>, vector<2x10xf32>
    tpu.vector_store %arg6[%c0_11, %c0_12], %12 {strides = array<i32>} : memref<2x10xf32, #tpu.memory_space<vmem>>, vector<2x10xf32>,
    return
  }
  func.func @transform_0(%arg0: i32) -> (i32, i32) {
    %c0_i32 = arith.constant 0 : i32
    %c0_i32_0 = arith.constant 0 : i32
    return %arg0, %c0_i32 : i32, i32
  }
  func.func @transform_1(%arg0: i32) -> (i32, i32) {
    %c0_i32 = arith.constant 0 : i32
    %c0_i32_0 = arith.constant 0 : i32
    %c0_i32_1 = arith.constant 0 : i32
    return %c0_i32, %c0_i32_0 : i32, i32
  }
  func.func @transform_2(%arg0: i32) -> (i32, i32) {
    %c0_i32 = arith.constant 0 : i32
    %c0_i32_0 = arith.constant 0 : i32
    %c0_i32_1 = arith.constant 0 : i32
    return %c0_i32, %c0_i32_0 : i32, i32
  }
  func.func @transform_3(%arg0: i32) -> (i32, i32) {
    %c0_i32 = arith.constant 0 : i32
    %c0_i32_0 = arith.constant 0 : i32
    %c0_i32_1 = arith.constant 0 : i32
    return %c0_i32, %c0_i32_0 : i32, i32
  }
  func.func @transform_4(%arg0: i32) -> (i32, i32) {
    %c0_i32 = arith.constant 0 : i32
    %c0_i32_0 = arith.constant 0 : i32
    %c0_i32_1 = arith.constant 0 : i32
    return %c0_i32, %c0_i32_0 : i32, i32
  }
  func.func @transform_5(%arg0: i32) -> (i32, i32) {
    %c0_i32 = arith.constant 0 : i32
    %c0_i32_0 = arith.constant 0 : i32
    return %arg0, %c0_i32 : i32, i32
  }
}

</mosaic_0001>

<bundles_post_ra>
// kernel: better_fashion_classifier.3
= control target key start
LH: loop header
LB: loop body
LE: loop exit
PB: predicated region body
PF: predicated region fallthrough
CT: control target
= control target key end

     0   :  { %s1361_s12 = smov 0   ;;  %s1363_s13 = smov 0   ;;  %s2000_s0 = inlined_call_operand.vmem [shape: bf16[4,392,9], index: 0, kind: input, shape index: {}]   ;;  %s2001_s1 = inlined_call_operand.vmem [shape: bf16[9,32], index: 1, kind: input, shape index: {}]   ;;  %s2002_s2 = inlined_call_operand.vmem [shape: f32[1,32], index: 2, kind: input, shape index: {}]   ;;  %s2003_s3 = inlined_call_operand.vmem [shape: bf16[392,32], index: 3, kind: output, shape index: {}]  }
   0x1   :  { %s1365_s14 = smov 0  }
   0x2 LB: > { %s22_s15 = sadd.s32 1, %s1334_s13  ;;  %p1127_p0 = scmp.ge.s32.totalorder %s1338_s14, 1  ;;  %s1338_s14 = sphi %s1365_s14, %s13_s14   ;;  %s1334_s13 = sphi %s1363_s13, %s2005_s13   ;;  %s1330_s12 = sphi %s1361_s12, %s2004_s12  }
   0x3   : > { %p23_p1 = scmp.ge.s32.totalorder %s22_s15, 4  ;;  %p156_p2 = scmp.lt.s32.totalorder %s1338_s14, 5 }
   0x5   : > { %s2007_s15 = smov (%p23_p1, %s22_s15), 0  ;;  %p157_p3 = pnand %p1127_p0, %p156_p2 }
   0x6   : > { %p185_p4 = scmp.lt.s32.totalorder (!%p157_p3), %s1330_s12, 3  ;;  %p1254_p5 = scmp.ne.s32.totalorder (!%p157_p3), %s1330_s12, 0 }
   0x7   : > { %160 = sbr.rel (%p157_p3) target bundleno = 431 (0x1af), region = 32 }
   0xc   : > { %v1227_v0 = vld [vmem:[%s2001_s1] sm:$0xf]  ;;  %v1285_v1 = vld [vmem:[%s2001_s1] sm:$0x10]  ;;  %vm456_vm0 = vcmask 1043456   ;;  %vm457_vm1 = vcmask 1044480  }
   0xd   : > { %v1228_v2 = vor.u32 %v1285_v1, %v1227_v0  ;;  %v1340_v3 = vmov 65535   ;;  %s186_s20 = scalar_select %p185_p4, %s1330_s12, 3  ;;  %vm380_vm2 = vcmask 72704  }
   0xe   : > { %v458_v4 = vsel %vm456_vm0, 4294967295, %v1340_v3 }
   0xf   : > { %v459_v5 = vsel %vm457_vm1, %v458_v4, 0  ;;  %s1289_s21 = smul.u32 196, %s186_s20 }
  0x10   : > { %v461_v6 = vand.u32 %v1228_v2, %v459_v5 }
  0x11   : > { %s1392_s24 = scalar_lea.vmem %s2000_s0, %s1289_s21 }
  0x12   : > { %470 = vmatpush.bf16.msra.mxu0 %v461_v6  ;;  %1286 = vmatpush.bf16.msra.mxu1 %v461_v6  ;;  %v1261_v7 = vld [vmem:[%s1392_s24] sm:$0xff]  ;;  %v1268_v8 = vld [vmem:[%s1392_s24 + $0x38] sm:$0xff]  ;;  %v1275_v9 = vld [vmem:[%s1392_s24 + $0x70] sm:$0xff] }
  0x13   : > { %1287 = vmatpush.bf16.msra.mxu2 %v461_v6  ;;  %1288 = vmatpush.bf16.msra.mxu3 %v461_v6  ;;  %v1282_v10 = vld [vmem:[%s1392_s24 + $0xa8] sm:$0xff]  ;;  %v1269_v12 = vld [vmem:[%s1392_s24 + $0x40] sm:$0xff]  ;;  %v1276_v13 = vld [vmem:[%s1392_s24 + $0x78] sm:$0xff] }
  0x14   : > { %v1262_v11 = vld [vmem:[%s1392_s24 + $0x8] sm:$0xff]  ;;  %v1283_v14 = vld [vmem:[%s1392_s24 + $0xb0] sm:$0xff]  ;;  %v1277_v17 = vld [vmem:[%s1392_s24 + $0x80] sm:$0xff] }
  0x15   : > { %1229 = vmatmul.msk.bf16.vlgmr.msra.gmra.mxu0 %vm380_vm2, %v1261_v7  ;;  %1236 = vmatmul.msk.bf16.vlgmr.msra.gmra.mxu1 %vm380_vm2, %v1268_v8  ;;  %v1263_v15 = vld [vmem:[%s1392_s24 + $0x10] sm:$0xff]  ;;  %v1270_v16 = vld [vmem:[%s1392_s24 + $0x48] sm:$0xff]  ;;  %v1284_v18 = vld [vmem:[%s1392_s24 + $0xb8] sm:$0xff] }
  0x16   : > { %1243 = vmatmul.msk.bf16.vlgmr.msra.gmra.mxu2 %vm380_vm2, %v1275_v9  ;;  %1250 = vmatmul.msk.bf16.vlgmr.msra.gmra.mxu3 %vm380_vm2, %v1282_v10  ;;  %v1264_v19 = vld [vmem:[%s1392_s24 + $0x18] sm:$0xff]  ;;  %v1271_v20 = vld [vmem:[%s1392_s24 + $0x50] sm:$0xff]  ;;  %v1278_v21 = vld [vmem:[%s1392_s24 + $0x88] sm:$0xff] }
  0x17   : > { %v249_v22 = vld [vmem:[%s1392_s24 + $0xc0] sm:$0xf]  ;;  %v1272_v26 = vld [vmem:[%s1392_s24 + $0x58] sm:$0xff]  ;;  %v1279_v27 = vld [vmem:[%s1392_s24 + $0x90] sm:$0xff] }
  0x18   : > { %v349_v23 = vunpack.c.l.b16 %v249_v22  ;;  %v1265_v25 = vld [vmem:[%s1392_s24 + $0x20] sm:$0xff]  ;;  %v1266_v28 = vld [vmem:[%s1392_s24 + $0x28] sm:$0xff]  ;;  %v1280_v30 = vld [vmem:[%s1392_s24 + $0x98] sm:$0xff] }
  0x19   : > { %v1273_v29 = vld [vmem:[%s1392_s24 + $0x60] sm:$0xff]  ;;  %v1267_v31 = vld [vmem:[%s1392_s24 + $0x30] sm:$0xff]  ;;  %v1274_v32 = vld [vmem:[%s1392_s24 + $0x68] sm:$0xff] }
  0x1a   : > { %v374_v24 = vpack.c.b16 %v349_v23, %v349_v23  ;;  %v1281_v33 = vld [vmem:[%s1392_s24 + $0xa0] sm:$0xff] }
  0x25   : > { %1230 = vmatmul.msk.bf16.gmra.mxu0 %vm380_vm2, %v1262_v11  ;;  %1237 = vmatmul.msk.bf16.gmra.mxu1 %vm380_vm2, %v1269_v12 }
  0x26   : > { %1244 = vmatmul.msk.bf16.gmra.mxu2 %vm380_vm2, %v1276_v13  ;;  %1251 = vmatmul.msk.bf16.gmra.mxu3 %vm380_vm2, %v1283_v14 }
  0x35   : > { %1231 = vmatmul.msk.bf16.gmra.mxu0 %vm380_vm2, %v1263_v15  ;;  %1238 = vmatmul.msk.bf16.gmra.mxu1 %vm380_vm2, %v1270_v16 }
  0x36   : > { %1245 = vmatmul.msk.bf16.gmra.mxu2 %vm380_vm2, %v1277_v17  ;;  %1252 = vmatmul.msk.bf16.gmra.mxu3 %vm380_vm2, %v1284_v18 }
  0x45   : > { %1232 = vmatmul.msk.bf16.gmra.mxu0 %vm380_vm2, %v1264_v19  ;;  %1239 = vmatmul.msk.bf16.gmra.mxu1 %vm380_vm2, %v1271_v20 }
  0x46   : > { %1246 = vmatmul.msk.bf16.gmra.mxu2 %vm380_vm2, %v1278_v21  ;;  %1253 = vmatmul.msk.bf16.gmra.mxu3 %vm380_vm2, %v374_v24 }
  0x55   : > { %1233 = vmatmul.msk.bf16.gmra.mxu0 %vm380_vm2, %v1265_v25  ;;  %1240 = vmatmul.msk.bf16.gmra.mxu1 %vm380_vm2, %v1272_v26 }
  0x56   : > { %1247 = vmatmul.msk.bf16.gmra.mxu2 %vm380_vm2, %v1279_v27 }
  0x65   : > { %1234 = vmatmul.msk.bf16.gmra.mxu0 %vm380_vm2, %v1266_v28  ;;  %1241 = vmatmul.msk.bf16.gmra.mxu1 %vm380_vm2, %v1273_v29 }
  0x66   : > { %1248 = vmatmul.msk.bf16.gmra.mxu2 %vm380_vm2, %v1280_v30 }
  0x75   : > { %1235 = vmatmul.msk.bf16.gmra.mxu0 %vm380_vm2, %v1267_v31  ;;  %1242 = vmatmul.msk.bf16.gmra.mxu1 %vm380_vm2, %v1274_v32 }
  0x76   : > { %1249 = vmatmul.msk.bf16.gmra.mxu2 %vm380_vm2, %v1281_v33 }
  0x92   : > { %v1444_v34 = vpop.f32.mrf.mxu0  ;;  %v1446_v35 = vpop.f32.mrf.mxu1 }
  0x99   : > { %v1448_v36 = vpop.f32.mrf.mxu2  ;;  %v1456_v40 = vpop.f32.mrf.mxu3 }
  0x9a   : > { %v1450_v37 = vpop.f32.mrf.mxu0  ;;  %v1452_v38 = vpop.f32.mrf.mxu1 }
  0xa1   : > { %v1454_v39 = vpop.f32.mrf.mxu2  ;;  %v1464_v44 = vpop.f32.mrf.mxu3 }
  0xa2   : > { %v1458_v41 = vpop.f32.mrf.mxu0  ;;  %v1460_v42 = vpop.f32.mrf.mxu1 }
  0xa9   : > { %v1462_v43 = vpop.f32.mrf.mxu2  ;;  %v1472_v48 = vpop.f32.mrf.mxu3 }
  0xaa   : > { %v1466_v45 = vpop.f32.mrf.mxu0  ;;  %v1468_v46 = vpop.f32.mrf.mxu1 }
  0xb1   : > { %v1470_v47 = vpop.f32.mrf.mxu2  ;;  %v1480_v52 = vpop.f32.mrf.mxu3 }
  0xb2   : > { %v1474_v49 = vpop.f32.mrf.mxu0  ;;  %v1476_v50 = vpop.f32.mrf.mxu1 }
  0xb9   : > { %v1478_v51 = vpop.f32.mrf.mxu2  ;;  %v1488_v56 = vpop.f32.mrf.mxu3 }
  0xba   : > { %v1482_v53 = vpop.f32.mrf.mxu0  ;;  %v1484_v54 = vpop.f32.mrf.mxu1 }
  0xc1   : > { %v1486_v55 = vpop.f32.mrf.mxu2  ;;  %v1496_v60 = vpop.f32.mrf.mxu3 }
  0xc2   : > { %v1490_v57 = vpop.f32.mrf.mxu0  ;;  %v1492_v58 = vpop.f32.mrf.mxu1 }
  0xc9   : > { %v1494_v59 = vpop.f32.mrf.mxu2  ;;  %v1504_v0 = vpop.f32.mrf.mxu3 }
  0xca   : > { %v1498_v61 = vpop.f32.mrf.mxu0  ;;  %v1500_v62 = vpop.f32.mrf.mxu1 }
  0xd1   : > { %v1502_v63 = vpop.f32.mrf.mxu2  ;;  %v594_v4 = vpop.f32.mrf.mxu3 }
  0xd2   : > { %v1506_v1 = vpop.f32.mrf.mxu0  ;;  %v1508_v2 = vpop.f32.mrf.mxu1 }
  0xd9   : > { %v1510_v3 = vpop.f32.mrf.mxu2 }
  0xda   : > { %v1512_v5 = vpop.f32.mrf.mxu0  ;;  %v1514_v6 = vpop.f32.mrf.mxu1 }
  0xe1   : > { %v1516_v7 = vpop.f32.mrf.mxu2 }
  0xe2   : > { %v1518_v8 = vpop.f32.mrf.mxu0  ;;  %v1520_v9 = vpop.f32.mrf.mxu1 }
  0xe9   : > { %v1522_v10 = vpop.f32.mrf.mxu2 }
  0xea   : > { %v1524_v11 = vpop.f32.mrf.mxu0  ;;  %v1526_v12 = vpop.f32.mrf.mxu1 }
  0xf1   : > { %v1528_v13 = vpop.f32.mrf.mxu2 }
  0xf2   : > { %v1530_v14 = vpop.f32.mrf.mxu0  ;;  %v1532_v15 = vpop.f32.mrf.mxu1 }
  0xf9   : > { %v1534_v16 = vpop.f32.mrf.mxu2 }
  0xfa   : > { %v1536_v17 = vpop.f32.mrf.mxu0  ;;  %v1538_v18 = vpop.f32.mrf.mxu1 }
  0xfd   : > { %599 = sbr.rel (%p1254_p5) target bundleno = 308 (0x134), region = 36 }
 0x101   : > { %v1540_v19 = vpop.f32.mrf.mxu2 }
 0x102   : > { %vm600_vm3 = vcmask 261120  }
 0x103   : > { %601 = vst.msk [vmem:[#allocation2] sm:$0xff] %vm600_vm3, %v1444_v34 }
 0x104   : > { %602 = vst.msk [vmem:[#allocation2 + $0x8] sm:$0xff] %vm600_vm3, %v1450_v37 }
 0x105   : > { %603 = vst.msk [vmem:[#allocation2 + $0x10] sm:$0xff] %vm600_vm3, %v1458_v41 }
 0x106   : > { %604 = vst.msk [vmem:[#allocation2 + $0x18] sm:$0xff] %vm600_vm3, %v1466_v45 }
 0x107   : > { %605 = vst.msk [vmem:[#allocation2 + $0x20] sm:$0xff] %vm600_vm3, %v1474_v49 }
 0x108   : > { %606 = vst.msk [vmem:[#allocation2 + $0x28] sm:$0xff] %vm600_vm3, %v1482_v53 }
 0x109   : > { %607 = vst.msk [vmem:[#allocation2 + $0x30] sm:$0xff] %vm600_vm3, %v1490_v57 }
 0x10a   : > { %608 = vst.msk [vmem:[#allocation2 + $0x38] sm:$0xff] %vm600_vm3, %v1498_v61 }
 0x10b   : > { %609 = vst.msk [vmem:[#allocation2 + $0x40] sm:$0xff] %vm600_vm3, %v1506_v1 }
 0x10c   : > { %610 = vst.msk [vmem:[#allocation2 + $0x48] sm:$0xff] %vm600_vm3, %v1512_v5 }
 0x10d   : > { %611 = vst.msk [vmem:[#allocation2 + $0x50] sm:$0xff] %vm600_vm3, %v1518_v8 }
 0x10e   : > { %612 = vst.msk [vmem:[#allocation2 + $0x58] sm:$0xff] %vm600_vm3, %v1524_v11 }
 0x10f   : > { %613 = vst.msk [vmem:[#allocation2 + $0x60] sm:$0xff] %vm600_vm3, %v1530_v14 }
 0x110   : > { %614 = vst.msk [vmem:[#allocation2 + $0x68] sm:$0xff] %vm600_vm3, %v1536_v17 }
 0x111   : > { %615 = vst.msk [vmem:[#allocation2 + $0x70] sm:$0xff] %vm600_vm3, %v1446_v35 }
 0x112   : > { %616 = vst.msk [vmem:[#allocation2 + $0x78] sm:$0xff] %vm600_vm3, %v1452_v38 }
 0x113   : > { %617 = vst.msk [vmem:[#allocation2 + $0x80] sm:$0xff] %vm600_vm3, %v1460_v42 }
 0x114   : > { %618 = vst.msk [vmem:[#allocation2 + $0x88] sm:$0xff] %vm600_vm3, %v1468_v46 }
 0x115   : > { %619 = vst.msk [vmem:[#allocation2 + $0x90] sm:$0xff] %vm600_vm3, %v1476_v50 }
 0x116   : > { %620 = vst.msk [vmem:[#allocation2 + $0x98] sm:$0xff] %vm600_vm3, %v1484_v54 }
 0x117   : > { %621 = vst.msk [vmem:[#allocation2 + $0xa0] sm:$0xff] %vm600_vm3, %v1492_v58 }
 0x118   : > { %622 = vst.msk [vmem:[#allocation2 + $0xa8] sm:$0xff] %vm600_vm3, %v1500_v62 }
 0x119   : > { %623 = vst.msk [vmem:[#allocation2 + $0xb0] sm:$0xff] %vm600_vm3, %v1508_v2 }
 0x11a   : > { %624 = vst.msk [vmem:[#allocation2 + $0xb8] sm:$0xff] %vm600_vm3, %v1514_v6 }
 0x11b   : > { %625 = vst.msk [vmem:[#allocation2 + $0xc0] sm:$0xff] %vm600_vm3, %v1520_v9 }
 0x11c   : > { %626 = vst.msk [vmem:[#allocation2 + $0xc8] sm:$0xff] %vm600_vm3, %v1526_v12 }
 0x11d   : > { %627 = vst.msk [vmem:[#allocation2 + $0xd0] sm:$0xff] %vm600_vm3, %v1532_v15 }
 0x11e   : > { %628 = vst.msk [vmem:[#allocation2 + $0xd8] sm:$0xff] %vm600_vm3, %v1538_v18 }
 0x11f   : > { %629 = vst.msk [vmem:[#allocation2 + $0xe0] sm:$0xff] %vm600_vm3, %v1448_v36 }
 0x120   : > { %630 = vst.msk [vmem:[#allocation2 + $0xe8] sm:$0xff] %vm600_vm3, %v1454_v39 }
 0x121   : > { %631 = vst.msk [vmem:[#allocation2 + $0xf0] sm:$0xff] %vm600_vm3, %v1462_v43 }
 0x122   : > { %632 = vst.msk [vmem:[#allocation2 + $0xf8] sm:$0xff] %vm600_vm3, %v1470_v47 }
 0x123   : > { %633 = vst.msk [vmem:[#allocation2 + $0x100] sm:$0xff] %vm600_vm3, %v1478_v51 }
 0x124   : > { %634 = vst.msk [vmem:[#allocation2 + $0x108] sm:$0xff] %vm600_vm3, %v1486_v55 }
 0x125   : > { %635 = vst.msk [vmem:[#allocation2 + $0x110] sm:$0xff] %vm600_vm3, %v1494_v59 }
 0x126   : > { %636 = vst.msk [vmem:[#allocation2 + $0x118] sm:$0xff] %vm600_vm3, %v1502_v63 }
 0x127   : > { %637 = vst.msk [vmem:[#allocation2 + $0x120] sm:$0xff] %vm600_vm3, %v1510_v3 }
 0x128   : > { %638 = vst.msk [vmem:[#allocation2 + $0x128] sm:$0xff] %vm600_vm3, %v1516_v7 }
 0x129   : > { %639 = vst.msk [vmem:[#allocation2 + $0x130] sm:$0xff] %vm600_vm3, %v1522_v10 }
 0x12a   : > { %640 = vst.msk [vmem:[#allocation2 + $0x138] sm:$0xff] %vm600_vm3, %v1528_v13 }
 0x12b   : > { %641 = vst.msk [vmem:[#allocation2 + $0x140] sm:$0xff] %vm600_vm3, %v1534_v16 }
 0x12c   : > { %642 = vst.msk [vmem:[#allocation2 + $0x148] sm:$0xff] %vm600_vm3, %v1540_v19 }
 0x12d   : > { %643 = vst.msk [vmem:[#allocation2 + $0x150] sm:$0xff] %vm600_vm3, %v1456_v40 }
 0x12e   : > { %644 = vst.msk [vmem:[#allocation2 + $0x158] sm:$0xff] %vm600_vm3, %v1464_v44 }
 0x12f   : > { %645 = vst.msk [vmem:[#allocation2 + $0x160] sm:$0xff] %vm600_vm3, %v1472_v48 }
 0x130   : > { %646 = vst.msk [vmem:[#allocation2 + $0x168] sm:$0xff] %vm600_vm3, %v1480_v52 }
 0x131   : > { %647 = vst.msk [vmem:[#allocation2 + $0x170] sm:$0xff] %vm600_vm3, %v1488_v56 }
 0x132   : > { %648 = vst.msk [vmem:[#allocation2 + $0x178] sm:$0xff] %vm600_vm3, %v1496_v60 }
 0x133   : > { %649 = vst.msk [vmem:[#allocation2 + $0x180] sm:$0xff] %vm600_vm3, %v1504_v0 }
 0x134 PF: > { %p1255_p6 = scmp.eq.s32.totalorder %s1330_s12, 0 }
 0x136   : > { %653 = sbr.rel (%p1255_p6) target bundleno = 367 (0x16f), region = 40 }
 0x13b   : > { %v654_v20 = vld [vmem:[#allocation2] sm:$0xff]  ;;  %vm752_vm4 = vcmask 261120   ;;  %v655_v21 = vld [vmem:[#allocation2 + $0x8] sm:$0xff]  ;;  %v656_v22 = vld [vmem:[#allocation2 + $0x10] sm:$0xff] }
 0x13c   : > { %v703_v23 = vmax.f32 %v654_v20, %v1444_v34  ;;  %v704_v24 = vmax.f32 %v655_v21, %v1450_v37  ;;  %v705_v25 = vmax.f32 %v656_v22, %v1458_v41  ;;  %v657_v26 = vld [vmem:[#allocation2 + $0x18] sm:$0xff]  ;;  %v658_v27 = vld [vmem:[#allocation2 + $0x20] sm:$0xff]  ;;  %v659_v28 = vld [vmem:[#allocation2 + $0x28] sm:$0xff] }
 0x13d   : > { %v706_v29 = vmax.f32 %v657_v26, %v1466_v45  ;;  %v660_v30 = vld [vmem:[#allocation2 + $0x30] sm:$0xff]  ;;  %v707_v31 = vmax.f32 %v658_v27, %v1474_v49  ;;  %v661_v32 = vld [vmem:[#allocation2 + $0x38] sm:$0xff]  ;;  %v708_v33 = vmax.f32 %v659_v28, %v1482_v53  ;;  %v662_v34 = vld [vmem:[#allocation2 + $0x40] sm:$0xff] }
 0x13e   : > { %753 = vst.msk [vmem:[#allocation2] sm:$0xff] %vm752_vm4, %v703_v23  ;;  %v709_v37 = vmax.f32 %v660_v30, %v1490_v57  ;;  %v663_v41 = vld [vmem:[#allocation2 + $0x48] sm:$0xff]  ;;  %v710_v45 = vmax.f32 %v661_v32, %v1498_v61  ;;  %v664_v4 = vld [vmem:[#allocation2 + $0x50] sm:$0xff]  ;;  %v711_v49 = vmax.f32 %v662_v34, %v1506_v1  ;;  %v665_v20 = vld [vmem:[#allocation2 + $0x58] sm:$0xff] }
 0x13f   : > { %754 = vst.msk [vmem:[#allocation2 + $0x8] sm:$0xff] %vm752_vm4, %v704_v24  ;;  %v712_v53 = vmax.f32 %v663_v41, %v1512_v5  ;;  %v666_v21 = vld [vmem:[#allocation2 + $0x60] sm:$0xff]  ;;  %v713_v57 = vmax.f32 %v664_v4, %v1518_v8  ;;  %v667_v22 = vld [vmem:[#allocation2 + $0x68] sm:$0xff]  ;;  %v714_v61 = vmax.f32 %v665_v20, %v1524_v11  ;;  %v668_v23 = vld [vmem:[#allocation2 + $0x70] sm:$0xff] }
 0x140   : > { %755 = vst.msk [vmem:[#allocation2 + $0x10] sm:$0xff] %vm752_vm4, %v705_v25  ;;  %v715_v1 = vmax.f32 %v666_v21, %v1530_v14  ;;  %v669_v24 = vld [vmem:[#allocation2 + $0x78] sm:$0xff]  ;;  %v716_v5 = vmax.f32 %v667_v22, %v1536_v17  ;;  %v670_v25 = vld [vmem:[#allocation2 + $0x80] sm:$0xff]  ;;  %v717_v8 = vmax.f32 %v668_v23, %v1446_v35  ;;  %v671_v26 = vld [vmem:[#allocation2 + $0x88] sm:$0xff] }
 0x141   : > { %756 = vst.msk [vmem:[#allocation2 + $0x18] sm:$0xff] %vm752_vm4, %v706_v29  ;;  %v718_v11 = vmax.f32 %v669_v24, %v1452_v38  ;;  %v672_v27 = vld [vmem:[#allocation2 + $0x90] sm:$0xff]  ;;  %v719_v14 = vmax.f32 %v670_v25, %v1460_v42  ;;  %v673_v28 = vld [vmem:[#allocation2 + $0x98] sm:$0xff]  ;;  %v720_v17 = vmax.f32 %v671_v26, %v1468_v46  ;;  %v674_v29 = vld [vmem:[#allocation2 + $0xa0] sm:$0xff] }
 0x142   : > { %757 = vst.msk [vmem:[#allocation2 + $0x20] sm:$0xff] %vm752_vm4, %v707_v31  ;;  %v721_v35 = vmax.f32 %v672_v27, %v1476_v50  ;;  %v675_v30 = vld [vmem:[#allocation2 + $0xa8] sm:$0xff]  ;;  %v722_v38 = vmax.f32 %v673_v28, %v1484_v54  ;;  %v676_v31 = vld [vmem:[#allocation2 + $0xb0] sm:$0xff]  ;;  %v723_v42 = vmax.f32 %v674_v29, %v1492_v58  ;;  %v677_v32 = vld [vmem:[#allocation2 + $0xb8] sm:$0xff] }
 0x143   : > { %758 = vst.msk [vmem:[#allocation2 + $0x28] sm:$0xff] %vm752_vm4, %v708_v33  ;;  %v724_v46 = vmax.f32 %v675_v30, %v1500_v62  ;;  %v678_v33 = vld [vmem:[#allocation2 + $0xc0] sm:$0xff]  ;;  %v725_v50 = vmax.f32 %v676_v31, %v1508_v2  ;;  %v679_v34 = vld [vmem:[#allocation2 + $0xc8] sm:$0xff]  ;;  %v726_v54 = vmax.f32 %v677_v32, %v1514_v6  ;;  %v681_v41 = vld [vmem:[#allocation2 + $0xd8] sm:$0xff] }
 0x144   : > { %759 = vst.msk [vmem:[#allocation2 + $0x30] sm:$0xff] %vm752_vm4, %v709_v37  ;;  %v680_v37 = vld [vmem:[#allocation2 + $0xd0] sm:$0xff]  ;;  %v727_v58 = vmax.f32 %v678_v33, %v1520_v9  ;;  %v728_v62 = vmax.f32 %v679_v34, %v1526_v12  ;;  %v683_v4 = vld [vmem:[#allocation2 + $0xe8] sm:$0xff]  ;;  %v730_v6 = vmax.f32 %v681_v41, %v1538_v18  ;;  %v685_v20 = vld [vmem:[#allocation2 + $0xf8] sm:$0xff] }
 0x145   : > { %760 = vst.msk [vmem:[#allocation2 + $0x38] sm:$0xff] %vm752_vm4, %v710_v45  ;;  %v682_v45 = vld [vmem:[#allocation2 + $0xe0] sm:$0xff]  ;;  %v729_v2 = vmax.f32 %v680_v37, %v1532_v15  ;;  %v732_v12 = vmax.f32 %v683_v4, %v1454_v39  ;;  %v687_v21 = vld [vmem:[#allocation2 + $0x108] sm:$0xff]  ;;  %v734_v18 = vmax.f32 %v685_v20, %v1470_v47  ;;  %v689_v22 = vld [vmem:[#allocation2 + $0x118] sm:$0xff] }
 0x146   : > { %761 = vst.msk [vmem:[#allocation2 + $0x40] sm:$0xff] %vm752_vm4, %v711_v49  ;;  %v684_v49 = vld [vmem:[#allocation2 + $0xf0] sm:$0xff]  ;;  %v731_v9 = vmax.f32 %v682_v45, %v1448_v36  ;;  %v736_v39 = vmax.f32 %v687_v21, %v1486_v55  ;;  %v691_v23 = vld [vmem:[#allocation2 + $0x128] sm:$0xff]  ;;  %v738_v47 = vmax.f32 %v689_v22, %v1502_v63  ;;  %v693_v24 = vld [vmem:[#allocation2 + $0x138] sm:$0xff] }
 0x147   : > { %762 = vst.msk [vmem:[#allocation2 + $0x48] sm:$0xff] %vm752_vm4, %v712_v53  ;;  %v686_v53 = vld [vmem:[#allocation2 + $0x100] sm:$0xff]  ;;  %v733_v15 = vmax.f32 %v684_v49, %v1462_v43  ;;  %v740_v55 = vmax.f32 %v691_v23, %v1516_v7  ;;  %v695_v25 = vld [vmem:[#allocation2 + $0x148] sm:$0xff]  ;;  %v742_v63 = vmax.f32 %v693_v24, %v1528_v13  ;;  %v697_v26 = vld [vmem:[#allocation2 + $0x158] sm:$0xff] }
 0x148   : > { %763 = vst.msk [vmem:[#allocation2 + $0x50] sm:$0xff] %vm752_vm4, %v713_v57  ;;  %v688_v57 = vld [vmem:[#allocation2 + $0x110] sm:$0xff]  ;;  %v735_v36 = vmax.f32 %v686_v53, %v1478_v51  ;;  %v744_v7 = vmax.f32 %v695_v25, %v1540_v19  ;;  %v699_v27 = vld [vmem:[#allocation2 + $0x168] sm:$0xff]  ;;  %v746_v13 = vmax.f32 %v697_v26, %v1464_v44  ;;  %v701_v28 = vld [vmem:[#allocation2 + $0x178] sm:$0xff] }
 0x149   : > { %764 = vst.msk [vmem:[#allocation2 + $0x58] sm:$0xff] %vm752_vm4, %v714_v61  ;;  %v690_v61 = vld [vmem:[#allocation2 + $0x120] sm:$0xff]  ;;  %v737_v43 = vmax.f32 %v688_v57, %v1494_v59  ;;  %v748_v19 = vmax.f32 %v699_v27, %v1480_v52  ;;  %v750_v29 = vmax.f32 %v701_v28, %v1496_v60 }
 0x14a   : > { %765 = vst.msk [vmem:[#allocation2 + $0x60] sm:$0xff] %vm752_vm4, %v715_v1  ;;  %v692_v1 = vld [vmem:[#allocation2 + $0x130] sm:$0xff]  ;;  %v739_v51 = vmax.f32 %v690_v61, %v1510_v3 }
 0x14b   : > { %766 = vst.msk [vmem:[#allocation2 + $0x68] sm:$0xff] %vm752_vm4, %v716_v5  ;;  %v694_v5 = vld [vmem:[#allocation2 + $0x140] sm:$0xff]  ;;  %v741_v59 = vmax.f32 %v692_v1, %v1522_v10 }
 0x14c   : > { %767 = vst.msk [vmem:[#allocation2 + $0x70] sm:$0xff] %vm752_vm4, %v717_v8  ;;  %v696_v8 = vld [vmem:[#allocation2 + $0x150] sm:$0xff]  ;;  %v743_v3 = vmax.f32 %v694_v5, %v1534_v16 }
 0x14d   : > { %768 = vst.msk [vmem:[#allocation2 + $0x78] sm:$0xff] %vm752_vm4, %v718_v11  ;;  %v698_v11 = vld [vmem:[#allocation2 + $0x160] sm:$0xff]  ;;  %v745_v10 = vmax.f32 %v696_v8, %v1456_v40 }
 0x14e   : > { %769 = vst.msk [vmem:[#allocation2 + $0x80] sm:$0xff] %vm752_vm4, %v719_v14  ;;  %v700_v14 = vld [vmem:[#allocation2 + $0x170] sm:$0xff]  ;;  %v747_v16 = vmax.f32 %v698_v11, %v1472_v48 }
 0x14f   : > { %770 = vst.msk [vmem:[#allocation2 + $0x88] sm:$0xff] %vm752_vm4, %v720_v17  ;;  %v702_v17 = vld [vmem:[#allocation2 + $0x180] sm:$0xff]  ;;  %v749_v40 = vmax.f32 %v700_v14, %v1488_v56 }
 0x150   : > { %771 = vst.msk [vmem:[#allocation2 + $0x90] sm:$0xff] %vm752_vm4, %v721_v35  ;;  %v751_v44 = vmax.f32 %v702_v17, %v1504_v0 }
 0x151   : > { %772 = vst.msk [vmem:[#allocation2 + $0x98] sm:$0xff] %vm752_vm4, %v722_v38 }
 0x152   : > { %773 = vst.msk [vmem:[#allocation2 + $0xa0] sm:$0xff] %vm752_vm4, %v723_v42 }
 0x153   : > { %774 = vst.msk [vmem:[#allocation2 + $0xa8] sm:$0xff] %vm752_vm4, %v724_v46 }
 0x154   : > { %775 = vst.msk [vmem:[#allocation2 + $0xb0] sm:$0xff] %vm752_vm4, %v725_v50 }
 0x155   : > { %776 = vst.msk [vmem:[#allocation2 + $0xb8] sm:$0xff] %vm752_vm4, %v726_v54 }
 0x156   : > { %777 = vst.msk [vmem:[#allocation2 + $0xc0] sm:$0xff] %vm752_vm4, %v727_v58 }
 0x157   : > { %778 = vst.msk [vmem:[#allocation2 + $0xc8] sm:$0xff] %vm752_vm4, %v728_v62 }
 0x158   : > { %779 = vst.msk [vmem:[#allocation2 + $0xd0] sm:$0xff] %vm752_vm4, %v729_v2 }
 0x159   : > { %780 = vst.msk [vmem:[#allocation2 + $0xd8] sm:$0xff] %vm752_vm4, %v730_v6 }
 0x15a   : > { %781 = vst.msk [vmem:[#allocation2 + $0xe0] sm:$0xff] %vm752_vm4, %v731_v9 }
 0x15b   : > { %782 = vst.msk [vmem:[#allocation2 + $0xe8] sm:$0xff] %vm752_vm4, %v732_v12 }
 0x15c   : > { %783 = vst.msk [vmem:[#allocation2 + $0xf0] sm:$0xff] %vm752_vm4, %v733_v15 }
 0x15d   : > { %784 = vst.msk [vmem:[#allocation2 + $0xf8] sm:$0xff] %vm752_vm4, %v734_v18 }
 0x15e   : > { %785 = vst.msk [vmem:[#allocation2 + $0x100] sm:$0xff] %vm752_vm4, %v735_v36 }
 0x15f   : > { %786 = vst.msk [vmem:[#allocation2 + $0x108] sm:$0xff] %vm752_vm4, %v736_v39 }
 0x160   : > { %787 = vst.msk [vmem:[#allocation2 + $0x110] sm:$0xff] %vm752_vm4, %v737_v43 }
 0x161   : > { %788 = vst.msk [vmem:[#allocation2 + $0x118] sm:$0xff] %vm752_vm4, %v738_v47 }
 0x162   : > { %789 = vst.msk [vmem:[#allocation2 + $0x120] sm:$0xff] %vm752_vm4, %v739_v51 }
 0x163   : > { %790 = vst.msk [vmem:[#allocation2 + $0x128] sm:$0xff] %vm752_vm4, %v740_v55 }
 0x164   : > { %791 = vst.msk [vmem:[#allocation2 + $0x130] sm:$0xff] %vm752_vm4, %v741_v59 }
 0x165   : > { %792 = vst.msk [vmem:[#allocation2 + $0x138] sm:$0xff] %vm752_vm4, %v742_v63 }
 0x166   : > { %793 = vst.msk [vmem:[#allocation2 + $0x140] sm:$0xff] %vm752_vm4, %v743_v3 }
 0x167   : > { %794 = vst.msk [vmem:[#allocation2 + $0x148] sm:$0xff] %vm752_vm4, %v744_v7 }
 0x168   : > { %795 = vst.msk [vmem:[#allocation2 + $0x150] sm:$0xff] %vm752_vm4, %v745_v10 }
 0x169   : > { %796 = vst.msk [vmem:[#allocation2 + $0x158] sm:$0xff] %vm752_vm4, %v746_v13 }
 0x16a   : > { %797 = vst.msk [vmem:[#allocation2 + $0x160] sm:$0xff] %vm752_vm4, %v747_v16 }
 0x16b   : > { %798 = vst.msk [vmem:[#allocation2 + $0x168] sm:$0xff] %vm752_vm4, %v748_v19 }
 0x16c   : > { %799 = vst.msk [vmem:[#allocation2 + $0x170] sm:$0xff] %vm752_vm4, %v749_v40 }
 0x16d   : > { %800 = vst.msk [vmem:[#allocation2 + $0x178] sm:$0xff] %vm752_vm4, %v750_v29 }
 0x16e   : > { %801 = vst.msk [vmem:[#allocation2 + $0x180] sm:$0xff] %vm752_vm4, %v751_v44 }
 0x16f PF: > { %p1256_p7 = scmp.ne.s32.totalorder %s1330_s12, 3 }
 0x171   : > { %805 = sbr.rel (%p1256_p7) target bundleno = 431 (0x1af), region = 44 }
 0x176   : > { %v806_v48 = vld [vmem:[#allocation2] sm:$0xff]  ;;  %v807_v56 = vld [vmem:[#allocation2 + $0x8] sm:$0xff]  ;;  %v808_v60 = vld [vmem:[#allocation2 + $0x10] sm:$0xff]  ;;  %vm1006_vm5 = vcmask 257024  }
 0x177   : > { %v1744_v52 = vld [vmem:[%s2002_s2] ss:$0 sm:$0xff]  ;;  %v809_v0 = vld [vmem:[#allocation2 + $0x18] sm:$0xff]  ;;  %v811_v32 = vld [vmem:[#allocation2 + $0x28] sm:$0xff] }
 0x178   : > { %v859_v35 = vadd.f32 %v1744_v52, %v806_v48  ;;  %v860_v30 = vadd.f32 %v1744_v52, %v807_v56  ;;  %v861_v38 = vadd.f32 %v1744_v52, %v808_v60  ;;  %v862_v31 = vadd.f32 %v1744_v52, %v809_v0  ;;  %v810_v42 = vld [vmem:[#allocation2 + $0x20] sm:$0xff]  ;;  %v812_v46 = vld [vmem:[#allocation2 + $0x30] sm:$0xff]  ;;  %v813_v54 = vld [vmem:[#allocation2 + $0x38] sm:$0xff] }
 0x179   : > { %v863_v33 = vadd.f32 %v1744_v52, %v810_v42  ;;  %v864_v50 = vadd.f32 %v1744_v52, %v811_v32  ;;  %v865_v34 = vadd.f32 %v1744_v52, %v812_v46  ;;  %v814_v45 = vld [vmem:[#allocation2 + $0x40] sm:$0xff]  ;;  %v866_v6 = vadd.f32 %v1744_v52, %v813_v54  ;;  %v815_v49 = vld [vmem:[#allocation2 + $0x48] sm:$0xff]  ;;  %v816_v9 = vld [vmem:[#allocation2 + $0x50] sm:$0xff] }
 0x17a   : > { %v908_v37 = vmax.f32 %v859_v35, 0.0  ;;  %v909_v58 = vmax.f32 %v860_v30, 0.0  ;;  %v910_v41 = vmax.f32 %v861_v38, 0.0  ;;  %v911_v62 = vmax.f32 %v862_v31, 0.0  ;;  %v817_v20 = vld [vmem:[#allocation2 + $0x58] sm:$0xff]  ;;  %v818_v18 = vld [vmem:[#allocation2 + $0x60] sm:$0xff] }
 0x17b   : > { %v912_v2 = vmax.f32 %v863_v33, 0.0  ;;  %v913_v4 = vmax.f32 %v864_v50, 0.0  ;;  %v914_v21 = vmax.f32 %v865_v34, 0.0  ;;  %v819_v57 = vld [vmem:[#allocation2 + $0x68] sm:$0xff]  ;;  %v820_v36 = vld [vmem:[#allocation2 + $0x70] sm:$0xff]  ;;  %v915_v61 = vmax.f32 %v866_v6, 0.0 }
 0x17c   : > { %v957_v12 = vpack.c.bf16 %v908_v37, %v908_v37  ;;  %v958_v53 = vpack.c.bf16 %v909_v58, %v909_v58  ;;  %v959_v15 = vpack.c.bf16 %v910_v41, %v910_v41  ;;  %v960_v22 = vpack.c.bf16 %v911_v62, %v911_v62  ;;  %v821_v51 = vld [vmem:[#allocation2 + $0x78] sm:$0xff]  ;;  %v822_v10 = vld [vmem:[#allocation2 + $0x80] sm:$0xff]  ;;  %v823_v27 = vld [vmem:[#allocation2 + $0x88] sm:$0xff] }
 0x17d   : > { %v961_v39 = vpack.c.bf16 %v912_v2, %v912_v2  ;;  %v867_v43 = vadd.f32 %v1744_v52, %v814_v45  ;;  %v868_v23 = vadd.f32 %v1744_v52, %v815_v49  ;;  %v869_v47 = vadd.f32 %v1744_v52, %v816_v9  ;;  %v824_v13 = vld [vmem:[#allocation2 + $0x90] sm:$0xff]  ;;  %v825_v28 = vld [vmem:[#allocation2 + $0x98] sm:$0xff]  ;;  %v826_v29 = vld [vmem:[#allocation2 + $0xa0] sm:$0xff] }
 0x17e   : > { %1007 = vst.msk [vmem:[%s2003_s3] sm:$0xf] %vm1006_vm5, %v957_v12  ;;  %v870_v1 = vadd.f32 %v1744_v52, %v817_v20  ;;  %v962_v24 = vpack.c.bf16 %v913_v4, %v913_v4  ;;  %v871_v55 = vadd.f32 %v1744_v52, %v818_v18  ;;  %v872_v5 = vadd.f32 %v1744_v52, %v819_v57  ;;  %v827_v0 = vld [vmem:[#allocation2 + $0xa8] sm:$0xff]  ;;  %v828_v31 = vld [vmem:[#allocation2 + $0xb0] sm:$0xff]  ;;  %v829_v33 = vld [vmem:[#allocation2 + $0xb8] sm:$0xff] }
 0x17f   : > { %1008 = vst.msk [vmem:[%s2003_s3 + $0x4] sm:$0xf] %vm1006_vm5, %v958_v53  ;;  %v873_v59 = vadd.f32 %v1744_v52, %v820_v36  ;;  %v963_v25 = vpack.c.bf16 %v914_v21, %v914_v21  ;;  %v916_v63 = vmax.f32 %v867_v43, 0.0  ;;  %v917_v8 = vmax.f32 %v868_v23, 0.0  ;;  %v830_v37 = vld [vmem:[#allocation2 + $0xc0] sm:$0xff]  ;;  %v831_v45 = vld [vmem:[#allocation2 + $0xc8] sm:$0xff] }
 0x180   : > { %1009 = vst.msk [vmem:[%s2003_s3 + $0x8] sm:$0xf] %vm1006_vm5, %v959_v15  ;;  %v918_v3 = vmax.f32 %v869_v47, 0.0  ;;  %v964_v26 = vpack.c.bf16 %v915_v61, %v915_v61  ;;  %v919_v7 = vmax.f32 %v870_v1, 0.0  ;;  %v874_v11 = vadd.f32 %v1744_v52, %v821_v51  ;;  %v832_v49 = vld [vmem:[#allocation2 + $0xd0] sm:$0xff]  ;;  %v833_v53 = vld [vmem:[#allocation2 + $0xd8] sm:$0xff] }
 0x181   : > { %1010 = vst.msk [vmem:[%s2003_s3 + $0xc] sm:$0xf] %vm1006_vm5, %v960_v22  ;;  %v965_v14 = vpack.c.bf16 %v916_v63, %v916_v63  ;;  %v920_v16 = vmax.f32 %v871_v55, 0.0  ;;  %v966_v19 = vpack.c.bf16 %v917_v8, %v917_v8  ;;  %v921_v17 = vmax.f32 %v872_v5, 0.0  ;;  %v834_v57 = vld [vmem:[#allocation2 + $0xe0] sm:$0xff]  ;;  %v835_v61 = vld [vmem:[#allocation2 + $0xe8] sm:$0xff] }
 0x182   : > { %1011 = vst.msk [vmem:[%s2003_s3 + $0x10] sm:$0xf] %vm1006_vm5, %v961_v39  ;;  %v922_v40 = vmax.f32 %v873_v59, 0.0  ;;  %v967_v44 = vpack.c.bf16 %v918_v3, %v918_v3  ;;  %v875_v48 = vadd.f32 %v1744_v52, %v822_v10  ;;  %v876_v56 = vadd.f32 %v1744_v52, %v823_v27  ;;  %v836_v1 = vld [vmem:[#allocation2 + $0xf0] sm:$0xff]  ;;  %v837_v5 = vld [vmem:[#allocation2 + $0xf8] sm:$0xff]  ;;  %v838_v8 = vld [vmem:[#allocation2 + $0x100] sm:$0xff] }
 0x183   : > { %1012 = vst.msk [vmem:[%s2003_s3 + $0x14] sm:$0xf] %vm1006_vm5, %v962_v24  ;;  %v877_v60 = vadd.f32 %v1744_v52, %v824_v13  ;;  %v968_v35 = vpack.c.bf16 %v919_v7, %v919_v7  ;;  %v923_v30 = vmax.f32 %v874_v11, 0.0  ;;  %v878_v38 = vadd.f32 %v1744_v52, %v825_v28  ;;  %v839_v11 = vld [vmem:[#allocation2 + $0x108] sm:$0xff] }
 0x184   : > { %1013 = vst.msk [vmem:[%s2003_s3 + $0x18] sm:$0xf] %vm1006_vm5, %v963_v25  ;;  %v969_v42 = vpack.c.bf16 %v920_v16, %v920_v16  ;;  %v924_v32 = vmax.f32 %v875_v48, 0.0  ;;  %v879_v46 = vadd.f32 %v1744_v52, %v826_v29  ;;  %v970_v50 = vpack.c.bf16 %v921_v17, %v921_v17  ;;  %v841_v17 = vld [vmem:[#allocation2 + $0x118] sm:$0xff]  ;;  %v842_v48 = vld [vmem:[#allocation2 + $0x120] sm:$0xff] }
 0x185   : > { %1014 = vst.msk [vmem:[%s2003_s3 + $0x1c] sm:$0xf] %vm1006_vm5, %v964_v26  ;;  %v925_v34 = vmax.f32 %v876_v56, 0.0  ;;  %v880_v54 = vadd.f32 %v1744_v52, %v827_v0  ;;  %v971_v58 = vpack.c.bf16 %v922_v40, %v922_v40  ;;  %v926_v41 = vmax.f32 %v877_v60, 0.0 }
 0x186   : > { %1015 = vst.msk [vmem:[%s2003_s3 + $0x20] sm:$0xf] %vm1006_vm5, %v965_v14  ;;  %v881_v62 = vadd.f32 %v1744_v52, %v828_v31  ;;  %v972_v2 = vpack.c.bf16 %v923_v30, %v923_v30  ;;  %v927_v4 = vmax.f32 %v878_v38, 0.0  ;;  %v882_v6 = vadd.f32 %v1744_v52, %v829_v33  ;;  %v840_v14 = vld [vmem:[#allocation2 + $0x110] sm:$0xff] }
 0x187   : > { %1016 = vst.msk [vmem:[%s2003_s3 + $0x24] sm:$0xf] %vm1006_vm5, %v966_v19  ;;  %v973_v9 = vpack.c.bf16 %v924_v32, %v924_v32  ;;  %v928_v20 = vmax.f32 %v879_v46, 0.0  ;;  %v883_v12 = vadd.f32 %v1744_v52, %v830_v37  ;;  %v974_v15 = vpack.c.bf16 %v925_v34, %v925_v34 }
 0x188   : > { %1017 = vst.msk [vmem:[%s2003_s3 + $0x28] sm:$0xf] %vm1006_vm5, %v967_v44  ;;  %v929_v21 = vmax.f32 %v880_v54, 0.0  ;;  %v884_v18 = vadd.f32 %v1744_v52, %v831_v45  ;;  %v975_v36 = vpack.c.bf16 %v926_v41, %v926_v41  ;;  %v930_v22 = vmax.f32 %v881_v62, 0.0 }
 0x189   : > { %1018 = vst.msk [vmem:[%s2003_s3 + $0x2c] sm:$0xf] %vm1006_vm5, %v968_v35  ;;  %v885_v39 = vadd.f32 %v1744_v52, %v832_v49  ;;  %v976_v43 = vpack.c.bf16 %v927_v4, %v927_v4  ;;  %v931_v23 = vmax.f32 %v882_v6, 0.0  ;;  %v886_v47 = vadd.f32 %v1744_v52, %v833_v53  ;;  %v843_v35 = vld [vmem:[#allocation2 + $0x128] sm:$0xff] }
 0x18a   : > { %1019 = vst.msk [vmem:[%s2003_s3 + $0x30] sm:$0xf] %vm1006_vm5, %v969_v42  ;;  %v977_v51 = vpack.c.bf16 %v928_v20, %v928_v20  ;;  %v932_v24 = vmax.f32 %v883_v12, 0.0  ;;  %v887_v55 = vadd.f32 %v1744_v52, %v834_v57  ;;  %v978_v59 = vpack.c.bf16 %v929_v21, %v929_v21  ;;  %v844_v42 = vld [vmem:[#allocation2 + $0x130] sm:$0xff] }
 0x18b   : > { %1020 = vst.msk [vmem:[%s2003_s3 + $0x34] sm:$0xf] %vm1006_vm5, %v970_v50  ;;  %v933_v25 = vmax.f32 %v884_v18, 0.0  ;;  %v888_v63 = vadd.f32 %v1744_v52, %v835_v61  ;;  %v979_v3 = vpack.c.bf16 %v930_v22, %v930_v22  ;;  %v934_v26 = vmax.f32 %v885_v39, 0.0  ;;  %v845_v50 = vld [vmem:[#allocation2 + $0x138] sm:$0xff] }
 0x18c   : > { %1021 = vst.msk [vmem:[%s2003_s3 + $0x38] sm:$0xf] %vm1006_vm5, %v971_v58  ;;  %v889_v7 = vadd.f32 %v1744_v52, %v836_v1  ;;  %v980_v10 = vpack.c.bf16 %v931_v23, %v931_v23  ;;  %v935_v27 = vmax.f32 %v886_v47, 0.0  ;;  %v890_v13 = vadd.f32 %v1744_v52, %v837_v5  ;;  %v846_v58 = vld [vmem:[#allocation2 + $0x140] sm:$0xff] }
 0x18d   : > { %1022 = vst.msk [vmem:[%s2003_s3 + $0x3c] sm:$0xf] %vm1006_vm5, %v972_v2  ;;  %v981_v16 = vpack.c.bf16 %v932_v24, %v932_v24  ;;  %v936_v28 = vmax.f32 %v887_v55, 0.0  ;;  %v891_v19 = vadd.f32 %v1744_v52, %v838_v8  ;;  %v982_v40 = vpack.c.bf16 %v933_v25, %v933_v25  ;;  %v847_v2 = vld [vmem:[#allocation2 + $0x148] sm:$0xff] }
 0x18e   : > { %1023 = vst.msk [vmem:[%s2003_s3 + $0x40] sm:$0xf] %vm1006_vm5, %v973_v9  ;;  %v937_v29 = vmax.f32 %v888_v63, 0.0  ;;  %v892_v44 = vadd.f32 %v1744_v52, %v839_v11  ;;  %v983_v56 = vpack.c.bf16 %v934_v26, %v934_v26  ;;  %v938_v60 = vmax.f32 %v889_v7, 0.0  ;;  %v848_v9 = vld [vmem:[#allocation2 + $0x150] sm:$0xff] }
 0x18f   : > { %1024 = vst.msk [vmem:[%s2003_s3 + $0x44] sm:$0xf] %vm1006_vm5, %v974_v15  ;;  %v893_v0 = vadd.f32 %v1744_v52, %v840_v14  ;;  %v984_v30 = vpack.c.bf16 %v935_v27, %v935_v27  ;;  %v939_v38 = vmax.f32 %v890_v13, 0.0  ;;  %v894_v31 = vadd.f32 %v1744_v52, %v841_v17  ;;  %v849_v15 = vld [vmem:[#allocation2 + $0x158] sm:$0xff] }
 0x190   : > { %1025 = vst.msk [vmem:[%s2003_s3 + $0x48] sm:$0xf] %vm1006_vm5, %v975_v36  ;;  %v985_v32 = vpack.c.bf16 %v936_v28, %v936_v28  ;;  %v940_v46 = vmax.f32 %v891_v19, 0.0  ;;  %v895_v33 = vadd.f32 %v1744_v52, %v842_v48  ;;  %v986_v34 = vpack.c.bf16 %v937_v29, %v937_v29  ;;  %v850_v36 = vld [vmem:[#allocation2 + $0x160] sm:$0xff] }
 0x191   : > { %1026 = vst.msk [vmem:[%s2003_s3 + $0x4c] sm:$0xf] %vm1006_vm5, %v976_v43  ;;  %v941_v54 = vmax.f32 %v892_v44, 0.0  ;;  %v896_v37 = vadd.f32 %v1744_v52, %v843_v35  ;;  %v987_v41 = vpack.c.bf16 %v938_v60, %v938_v60  ;;  %v942_v62 = vmax.f32 %v893_v0, 0.0  ;;  %v851_v43 = vld [vmem:[#allocation2 + $0x168] sm:$0xff] }
 0x192   : > { %1027 = vst.msk [vmem:[%s2003_s3 + $0x50] sm:$0xf] %vm1006_vm5, %v977_v51  ;;  %v897_v45 = vadd.f32 %v1744_v52, %v844_v42  ;;  %v988_v4 = vpack.c.bf16 %v939_v38, %v939_v38  ;;  %v943_v6 = vmax.f32 %v894_v31, 0.0  ;;  %v898_v49 = vadd.f32 %v1744_v52, %v845_v50  ;;  %v852_v51 = vld [vmem:[#allocation2 + $0x170] sm:$0xff] }
 0x193   : > { %1028 = vst.msk [vmem:[%s2003_s3 + $0x54] sm:$0xf] %vm1006_vm5, %v978_v59  ;;  %v989_v20 = vpack.c.bf16 %v940_v46, %v940_v46  ;;  %v944_v12 = vmax.f32 %v895_v33, 0.0  ;;  %v899_v53 = vadd.f32 %v1744_v52, %v846_v58  ;;  %v990_v21 = vpack.c.bf16 %v941_v54, %v941_v54  ;;  %v853_v59 = vld [vmem:[#allocation2 + $0x178] sm:$0xff] }
 0x194   : > { %1029 = vst.msk [vmem:[%s2003_s3 + $0x58] sm:$0xf] %vm1006_vm5, %v979_v3  ;;  %v945_v18 = vmax.f32 %v896_v37, 0.0  ;;  %v900_v57 = vadd.f32 %v1744_v52, %v847_v2  ;;  %v991_v22 = vpack.c.bf16 %v942_v62, %v942_v62  ;;  %v946_v39 = vmax.f32 %v897_v45, 0.0  ;;  %v854_v3 = vld [vmem:[#allocation2 + $0x180] sm:$0xff] }
 0x195   : > { %1030 = vst.msk [vmem:[%s2003_s3 + $0x5c] sm:$0xf] %vm1006_vm5, %v980_v10  ;;  %v901_v61 = vadd.f32 %v1744_v52, %v848_v9  ;;  %v992_v23 = vpack.c.bf16 %v943_v6, %v943_v6  ;;  %v947_v47 = vmax.f32 %v898_v49, 0.0  ;;  %v902_v1 = vadd.f32 %v1744_v52, %v849_v15 }
 0x196   : > { %1031 = vst.msk [vmem:[%s2003_s3 + $0x60] sm:$0xf] %vm1006_vm5, %v981_v16  ;;  %v993_v24 = vpack.c.bf16 %v944_v12, %v944_v12  ;;  %v948_v55 = vmax.f32 %v899_v53, 0.0  ;;  %v903_v5 = vadd.f32 %v1744_v52, %v850_v36  ;;  %v994_v25 = vpack.c.bf16 %v945_v18, %v945_v18 }
 0x197   : > { %1032 = vst.msk [vmem:[%s2003_s3 + $0x64] sm:$0xf] %vm1006_vm5, %v982_v40  ;;  %v949_v63 = vmax.f32 %v900_v57, 0.0  ;;  %v904_v8 = vadd.f32 %v1744_v52, %v851_v43  ;;  %v995_v26 = vpack.c.bf16 %v946_v39, %v946_v39  ;;  %v950_v7 = vmax.f32 %v901_v61, 0.0 }
 0x198   : > { %1033 = vst.msk [vmem:[%s2003_s3 + $0x68] sm:$0xf] %vm1006_vm5, %v983_v56  ;;  %v905_v11 = vadd.f32 %v1744_v52, %v852_v51  ;;  %v996_v10 = vpack.c.bf16 %v947_v47, %v947_v47  ;;  %v951_v27 = vmax.f32 %v902_v1, 0.0  ;;  %v906_v13 = vadd.f32 %v1744_v52, %v853_v59 }
 0x199   : > { %1034 = vst.msk [vmem:[%s2003_s3 + $0x6c] sm:$0xf] %vm1006_vm5, %v984_v30  ;;  %v997_v14 = vpack.c.bf16 %v948_v55, %v948_v55  ;;  %v952_v16 = vmax.f32 %v903_v5, 0.0  ;;  %v907_v28 = vadd.f32 %v1744_v52, %v854_v3  ;;  %v998_v19 = vpack.c.bf16 %v949_v63, %v949_v63 }
 0x19a   : > { %1035 = vst.msk [vmem:[%s2003_s3 + $0x70] sm:$0xf] %vm1006_vm5, %v985_v32  ;;  %v953_v17 = vmax.f32 %v904_v8, 0.0  ;;  %v999_v40 = vpack.c.bf16 %v950_v7, %v950_v7  ;;  %v954_v29 = vmax.f32 %v905_v11, 0.0  ;;  %v1000_v52 = vpack.c.bf16 %v951_v27, %v951_v27 }
 0x19b   : > { %1036 = vst.msk [vmem:[%s2003_s3 + $0x74] sm:$0xf] %vm1006_vm5, %v986_v34  ;;  %v955_v44 = vmax.f32 %v906_v13, 0.0  ;;  %v1001_v48 = vpack.c.bf16 %v952_v16, %v952_v16  ;;  %v956_v56 = vmax.f32 %v907_v28, 0.0 }
 0x19c   : > { %1037 = vst.msk [vmem:[%s2003_s3 + $0x78] sm:$0xf] %vm1006_vm5, %v987_v41  ;;  %v1002_v60 = vpack.c.bf16 %v953_v17, %v953_v17  ;;  %v1003_v0 = vpack.c.bf16 %v954_v29, %v954_v29 }
 0x19d   : > { %1038 = vst.msk [vmem:[%s2003_s3 + $0x7c] sm:$0xf] %vm1006_vm5, %v988_v4  ;;  %v1004_v35 = vpack.c.bf16 %v955_v44, %v955_v44  ;;  %v1005_v30 = vpack.c.bf16 %v956_v56, %v956_v56 }
 0x19e   : > { %1039 = vst.msk [vmem:[%s2003_s3 + $0x80] sm:$0xf] %vm1006_vm5, %v989_v20 }
 0x19f   : > { %1040 = vst.msk [vmem:[%s2003_s3 + $0x84] sm:$0xf] %vm1006_vm5, %v990_v21 }
 0x1a0   : > { %1041 = vst.msk [vmem:[%s2003_s3 + $0x88] sm:$0xf] %vm1006_vm5, %v991_v22 }
 0x1a1   : > { %1042 = vst.msk [vmem:[%s2003_s3 + $0x8c] sm:$0xf] %vm1006_vm5, %v992_v23 }
 0x1a2   : > { %1043 = vst.msk [vmem:[%s2003_s3 + $0x90] sm:$0xf] %vm1006_vm5, %v993_v24 }
 0x1a3   : > { %1044 = vst.msk [vmem:[%s2003_s3 + $0x94] sm:$0xf] %vm1006_vm5, %v994_v25 }
 0x1a4   : > { %1045 = vst.msk [vmem:[%s2003_s3 + $0x98] sm:$0xf] %vm1006_vm5, %v995_v26 }
 0x1a5   : > { %1046 = vst.msk [vmem:[%s2003_s3 + $0x9c] sm:$0xf] %vm1006_vm5, %v996_v10 }
 0x1a6   : > { %1047 = vst.msk [vmem:[%s2003_s3 + $0xa0] sm:$0xf] %vm1006_vm5, %v997_v14 }
 0x1a7   : > { %1048 = vst.msk [vmem:[%s2003_s3 + $0xa4] sm:$0xf] %vm1006_vm5, %v998_v19 }
 0x1a8   : > { %1049 = vst.msk [vmem:[%s2003_s3 + $0xa8] sm:$0xf] %vm1006_vm5, %v999_v40 }
 0x1a9   : > { %1050 = vst.msk [vmem:[%s2003_s3 + $0xac] sm:$0xf] %vm1006_vm5, %v1000_v52 }
 0x1aa   : > { %1051 = vst.msk [vmem:[%s2003_s3 + $0xb0] sm:$0xf] %vm1006_vm5, %v1001_v48 }
 0x1ab   : > { %1052 = vst.msk [vmem:[%s2003_s3 + $0xb4] sm:$0xf] %vm1006_vm5, %v1002_v60 }
 0x1ac   : > { %1053 = vst.msk [vmem:[%s2003_s3 + $0xb8] sm:$0xf] %vm1006_vm5, %v1003_v0 }
 0x1ad   : > { %1054 = vst.msk [vmem:[%s2003_s3 + $0xbc] sm:$0xf] %vm1006_vm5, %v1004_v35 }
 0x1ae   : > { %1055 = vst.msk [vmem:[%s2003_s3 + $0xc0] sm:$0xf] %vm1006_vm5, %v1005_v30 }
 0x1af PF: > { %s13_s14 = sadd.s32 1, %s1338_s14   ;;  %s2004_s12 = smov %s1334_s13 }
 0x1b0   : > { %p10_p8 = scmp.ge.s32.totalorder %s13_s14, 6   ;;  %s2005_s13 = smov %s2007_s15 }
 0x1b2   :  { %12 = sbr.rel (!%p10_p8) target bundleno = 2 (0x2), region = 74 }

// kernel: better_fashion_classifier.4
= control target key start
LH: loop header
LB: loop body
LE: loop exit
PB: predicated region body
PF: predicated region fallthrough
CT: control target
= control target key end

     0   :  { %s1120_s12 = smov 0   ;;  %s1122_s13 = smov 0   ;;  %s1376_s0 = inlined_call_operand.vmem [shape: bf16[4,98,288], index: 0, kind: input, shape index: {}]   ;;  %s1377_s1 = inlined_call_operand.vmem [shape: bf16[288,64], index: 1, kind: input, shape index: {}]   ;;  %s1378_s2 = inlined_call_operand.vmem [shape: f32[1,64], index: 2, kind: input, shape index: {}]   ;;  %s1379_s3 = inlined_call_operand.vmem [shape: bf16[98,64], index: 3, kind: output, shape index: {}]  }
   0x1   :  { %s1124_s14 = smov 0  }
   0x2 LB: > { %s22_s15 = sadd.s32 1, %s1094_s13  ;;  %p838_p0 = scmp.ge.s32.totalorder %s1098_s14, 1  ;;  %s1098_s14 = sphi %s1124_s14, %s13_s14   ;;  %s1094_s13 = sphi %s1122_s13, %s1381_s13   ;;  %s1090_s12 = sphi %s1120_s12, %s1380_s12  }
   0x3   : > { %p23_p1 = scmp.ge.s32.totalorder %s22_s15, 4  ;;  %p157_p2 = scmp.lt.s32.totalorder %s1098_s14, 5 }
   0x5   : > { %s1383_s15 = smov (%p23_p1, %s22_s15), 0  ;;  %p158_p3 = pnand %p838_p0, %p157_p2 }
   0x6   : > { %p187_p4 = scmp.lt.s32.totalorder (!%p158_p3), %s1090_s12, 3  ;;  %p991_p5 = scmp.ne.s32.totalorder (!%p158_p3), %s1090_s12, 0 }
   0x7   : > { %161 = sbr.rel (%p158_p3) target bundleno = 322 (0x142), region = 32 }
   0xc   : > { %v1023_v0 = vld [vmem:[%s1377_s1 + $0x38] sm:$0xff]  ;;  %v1033_v2 = vld [vmem:[%s1377_s1 + $0x88] sm:$0xff]  ;;  %v1022_v3 = vld [vmem:[%s1377_s1 + $0x30] sm:$0xff]  ;;  %s188_s24 = scalar_select %p187_p4, %s1090_s12, 3  ;;  %vm474_vm0 = vcmask 261120  }
   0xd   : > { %v1146_v1 = vld [vmem:[%s1377_s1 + $0x78] sm:$0xff]  ;;  %496 = vmatpush.bf16.msra.mxu0 %v1023_v0  ;;  %1034 = vmatpush.bf16.msra.mxu3 %v1023_v0  ;;  %v1030_v4 = vld [vmem:[%s1377_s1 + $0x70] sm:$0xff]  ;;  %v1032_v5 = vld [vmem:[%s1377_s1 + $0x80] sm:$0xff] }
   0xe   : > { %539 = vmatpush.bf16.msra.mxu1 %v1146_v1  ;;  %588 = vmatpush.bf16.msra.mxu2 %v1033_v2  ;;  %s1050_s29 = smul.u32 156, %s188_s24  ;;  %v1021_v6 = vld [vmem:[%s1377_s1 + $0x28] sm:$0xff]  ;;  %v1020_v11 = vld [vmem:[%s1377_s1 + $0x20] sm:$0xff]  ;;  %v1019_v13 = vld [vmem:[%s1377_s1 + $0x18] sm:$0xff] }
   0xf   : > { %v1029_v9 = vld [vmem:[%s1377_s1 + $0x68] sm:$0xff]  ;;  %v1028_v12 = vld [vmem:[%s1377_s1 + $0x60] sm:$0xff]  ;;  %v1027_v14 = vld [vmem:[%s1377_s1 + $0x58] sm:$0xff] }
  0x10   : > { %s1166_s5 = scalar_lea.vmem %s1376_s0, %s1050_s29  ;;  %v1018_v15 = vld [vmem:[%s1377_s1 + $0x10] sm:$0xff]  ;;  %v1017_v20 = vld [vmem:[%s1377_s1 + $0x8] sm:$0xff]  ;;  %v1016_v22 = vld [vmem:[%s1377_s1] sm:$0xff] }
  0x11   : > { %497 = vmatpush.bf16.msra.mxu0 %v1022_v3  ;;  %1035 = vmatpush.bf16.msra.mxu3 %v1022_v3  ;;  %v850_v7 = vld [vmem:[%s1166_s5 + $0x8] sm:$0xf]  ;;  %v1000_v8 = vld [vmem:[%s1166_s5 + $0x10] sm:$0xf0]  ;;  %v862_v17 = vld [vmem:[%s1166_s5 + $0x20] sm:$0xf] }
  0x12   : > { %540 = vmatpush.bf16.msra.mxu1 %v1030_v4  ;;  %589 = vmatpush.bf16.msra.mxu2 %v1032_v5  ;;  %v851_v10 = vor.u32 %v1000_v8, %v850_v7  ;;  %v1026_v16 = vld [vmem:[%s1377_s1 + $0x50] sm:$0xff]  ;;  %v1003_v18 = vld [vmem:[%s1166_s5 + $0x28] sm:$0xf0]  ;;  %v1024_v23 = vld [vmem:[%s1377_s1 + $0x40] sm:$0xff] }
  0x13   : > { %v863_v19 = vor.u32 %v1003_v18, %v862_v17  ;;  %v1025_v21 = vld [vmem:[%s1377_s1 + $0x48] sm:$0xff]  ;;  %v842_v24 = vld [vmem:[%s1166_s5] sm:$0xf]  ;;  %v902_v26 = vld [vmem:[%s1166_s5 + $0x78] sm:$0xf] }
  0x14   : > { %v999_v25 = vld [vmem:[%s1166_s5 + $0x8] sm:$0xf0]  ;;  %v1014_v27 = vld [vmem:[%s1166_s5 + $0x80] sm:$0xf0]  ;;  %v844_v29 = vld [vmem:[%s1166_s5 + $0xc] sm:$0xf0] }
  0x15   : > { %984 = vmatmul.msk.bf16.vlgmr.msra.gmra.mxu2 %vm474_vm0, %v851_v10  ;;  %498 = vmatpush.bf16.msra.mxu0 %v1021_v6  ;;  %v998_v28 = vld [vmem:[%s1166_s5 + $0x4] sm:$0xf]  ;;  %v843_v30 = vor.u32 %v999_v25, %v842_v24  ;;  %v903_v31 = vor.u32 %v1014_v27, %v902_v26  ;;  %v874_v33 = vld [vmem:[%s1166_s5 + $0x38] sm:$0xf]  ;;  %v228_v36 = vld [vmem:[%s1166_s5 + $0x90] sm:$0x11] }
  0x16   : > { %1036 = vmatpush.bf16.msra.mxu3 %v1021_v6  ;;  %541 = vmatpush.bf16.msra.mxu1 %v1029_v9  ;;  %v847_v32 = vor.u32 %v998_v28, %v844_v29  ;;  %v1006_v34 = vld [vmem:[%s1166_s5 + $0x40] sm:$0xf0]  ;;  %v854_v37 = vld [vmem:[%s1166_s5 + $0x18] sm:$0xf]  ;;  %v328_v39 = vunpack.c.l.b16 %v228_v36  ;;  %v1001_v40 = vld [vmem:[%s1166_s5 + $0x1c] sm:$0xf]  ;;  %v329_v62 = vunpack.c.h.b16 %v228_v36 }
  0x17   : > { %v875_v35 = vor.u32 %v1006_v34, %v874_v33  ;;  %v1002_v38 = vld [vmem:[%s1166_s5 + $0x20] sm:$0xf0]  ;;  %v856_v41 = vld [vmem:[%s1166_s5 + $0x24] sm:$0xf0]  ;;  %v886_v45 = vld [vmem:[%s1166_s5 + $0x50] sm:$0xf] }
  0x18   : > { %v855_v42 = vor.u32 %v1002_v38, %v854_v37  ;;  %v349_v43 = vpack.c.b16 %v328_v39, %v328_v39  ;;  %v859_v44 = vor.u32 %v1001_v40, %v856_v41  ;;  %v1009_v46 = vld [vmem:[%s1166_s5 + $0x58] sm:$0xf0]  ;;  %v866_v48 = vld [vmem:[%s1166_s5 + $0x30] sm:$0xf]  ;;  %v1004_v50 = vld [vmem:[%s1166_s5 + $0x34] sm:$0xf]  ;;  %v350_v3 = vpack.c.b16 %v329_v62, %v329_v62 }
  0x19   : > { %499 = vmatpush.bf16.msra.mxu0 %v1020_v11  ;;  %v887_v47 = vor.u32 %v1009_v46, %v886_v45  ;;  %v1005_v49 = vld [vmem:[%s1166_s5 + $0x38] sm:$0xf0]  ;;  %v868_v51 = vld [vmem:[%s1166_s5 + $0x3c] sm:$0xf0]  ;;  %v904_v53 = vld [vmem:[%s1166_s5 + $0x84] sm:$0xf0] }
  0x1a   : > { %1037 = vmatpush.bf16.msra.mxu3 %v1020_v11  ;;  %542 = vmatpush.bf16.msra.mxu1 %v1028_v12  ;;  %v1013_v52 = vld [vmem:[%s1166_s5 + $0x7c] sm:$0xf]  ;;  %v867_v54 = vor.u32 %v1005_v49, %v866_v48  ;;  %v871_v55 = vor.u32 %v1004_v50, %v868_v51  ;;  %v898_v57 = vld [vmem:[%s1166_s5 + $0x68] sm:$0xf]  ;;  %v1012_v58 = vld [vmem:[%s1166_s5 + $0x70] sm:$0xf0] }
  0x1b   : > { %v907_v56 = vor.u32 %v1013_v52, %v904_v53  ;;  %v899_v59 = vor.u32 %v1012_v58, %v898_v57  ;;  %v878_v60 = vld [vmem:[%s1166_s5 + $0x48] sm:$0xf]  ;;  %v1008_v61 = vld [vmem:[%s1166_s5 + $0x50] sm:$0xf0]  ;;  %v1007_v63 = vld [vmem:[%s1166_s5 + $0x4c] sm:$0xf] }
  0x1c   : > { %v880_v0 = vld [vmem:[%s1166_s5 + $0x54] sm:$0xf0]  ;;  %v1015_v5 = vld [vmem:[%s1166_s5 + $0x88] sm:$0xf0]  ;;  %v890_v7 = vld [vmem:[%s1166_s5 + $0x60] sm:$0xf] }
  0x1d   : > { %500 = vmatpush.bf16.msra.mxu0 %v1019_v13  ;;  %v883_v2 = vor.u32 %v1007_v63, %v880_v0  ;;  %v1011_v8 = vld [vmem:[%s1166_s5 + $0x68] sm:$0xf0]  ;;  %v892_v10 = vld [vmem:[%s1166_s5 + $0x6c] sm:$0xf0] }
  0x1e   : > { %1038 = vmatpush.bf16.msra.mxu3 %v1019_v13  ;;  %543 = vmatpush.bf16.msra.mxu1 %v1027_v14  ;;  %v891_v11 = vor.u32 %v1011_v8, %v890_v7  ;;  %v229_v13 = vld [vmem:[%s1166_s5 + $0x98] sm:$0x1] }
  0x21   : > { %501 = vmatpush.bf16.msra.mxu0 %v1018_v15 }
  0x22   : > { %1039 = vmatpush.bf16.msra.mxu3 %v1018_v15  ;;  %544 = vmatpush.bf16.msra.mxu1 %v1026_v16 }
  0x25   : > { %985 = vmatmul.msk.bf16.gmra.mxu2 %vm474_vm0, %v863_v19  ;;  %502 = vmatpush.bf16.msra.mxu0 %v1017_v20 }
  0x26   : > { %1040 = vmatpush.bf16.msra.mxu3 %v1017_v20  ;;  %545 = vmatpush.bf16.msra.mxu1 %v1025_v21 }
  0x29   : > { %503 = vmatpush.bf16.msra.mxu0 %v1016_v22 }
  0x2a   : > { %1041 = vmatpush.bf16.msra.mxu3 %v1016_v22  ;;  %546 = vmatpush.bf16.msra.mxu1 %v1024_v23 }
  0x2c   : > { %504 = vmatmul.bf16.vlgmr.msra.gmra.mxu0 %v843_v30 }
  0x2d   : > { %529 = vmatmul.bf16.vlgmr.msra.gmra.mxu3 %v903_v31  ;;  %547 = vmatmul.bf16.vlgmr.msra.gmra.mxu1 %v847_v32 }
  0x2e   : > { %1042 = vmatpush.bf16.msrb.mxu3 %v1146_v1  ;;  %v879_v1 = vor.u32 %v1008_v61, %v878_v60 }
  0x32   : > { %1043 = vmatpush.bf16.msrb.mxu3 %v1030_v4  ;;  %v910_v4 = vld [vmem:[%s1166_s5 + $0x80] sm:$0xf] }
  0x33   : > { %v911_v6 = vor.u32 %v1015_v5, %v910_v4 }
  0x35   : > { %986 = vmatmul.msk.bf16.gmra.mxu2 %vm474_vm0, %v875_v35 }
  0x36   : > { %1044 = vmatpush.bf16.msrb.mxu3 %v1029_v9  ;;  %v1010_v9 = vld [vmem:[%s1166_s5 + $0x64] sm:$0xf] }
  0x3a   : > { %1045 = vmatpush.bf16.msrb.mxu3 %v1028_v12  ;;  %v895_v12 = vor.u32 %v1010_v9, %v892_v10 }
  0x3c   : > { %509 = vmatmul.bf16.gmra.mxu0 %v855_v42 }
  0x3d   : > { %534 = vmatmul.bf16.gmra.mxu3 %v349_v43  ;;  %552 = vmatmul.bf16.gmra.mxu1 %v859_v44 }
  0x3e   : > { %1046 = vmatpush.bf16.msrb.mxu3 %v1027_v14  ;;  %v330_v14 = vunpack.c.l.b16 %v229_v13 }
  0x40   : > { %v351_v15 = vpack.c.b16 %v330_v14, %v330_v14 }
  0x42   : > { %1047 = vmatpush.bf16.msrb.mxu3 %v1026_v16 }
  0x45   : > { %987 = vmatmul.msk.bf16.gmra.mxu2 %vm474_vm0, %v887_v47 }
  0x46   : > { %1048 = vmatpush.bf16.msrb.mxu3 %v1025_v21 }
  0x4a   : > { %1049 = vmatpush.bf16.msrb.mxu3 %v1024_v23 }
  0x4c   : > { %514 = vmatmul.bf16.gmra.mxu0 %v867_v54 }
  0x4d   : > { %557 = vmatmul.bf16.gmra.mxu1 %v871_v55  ;;  %572 = vmatmul.bf16.vlgmr.msrb.gmra.mxu3 %v907_v56 }
  0x55   : > { %988 = vmatmul.msk.bf16.gmra.mxu2 %vm474_vm0, %v899_v59 }
  0x5c   : > { %519 = vmatmul.bf16.gmra.mxu0 %v879_v1 }
  0x5d   : > { %562 = vmatmul.bf16.gmra.mxu1 %v883_v2  ;;  %577 = vmatmul.bf16.gmra.mxu3 %v350_v3 }
  0x65   : > { %989 = vmatmul.msk.bf16.gmra.mxu2 %vm474_vm0, %v911_v6 }
  0x6c   : > { %524 = vmatmul.bf16.gmra.mxu0 %v891_v11 }
  0x6d   : > { %567 = vmatmul.bf16.gmra.mxu1 %v895_v12 }
  0x75   : > { %990 = vmatmul.msk.bf16.gmra.mxu2 %vm474_vm0, %v351_v15 }
  0x98   : > { %v591_v16 = vpop.f32.mrf.mxu2 }
  0xa0   : > { %v593_v17 = vpop.f32.mrf.mxu2 }
  0xa8   : > { %v596_v18 = vpop.f32.mrf.mxu2 }
  0xa9   : > { %v505_v19 = vpop.f32.mrf.mxu0 }
  0xaa   : > { %v548_v20 = vpop.f32.mrf.mxu1 }
  0xab   : > { %v549_v21 = vadd.f32 %v548_v20, %v505_v19 }
  0xad   : > { %v1250_v22 = vadd.f32 %v591_v16, %v549_v21 }
  0xb0   : > { %v530_v23 = vpop.f32.mrf.mxu3  ;;  %v598_v24 = vpop.f32.mrf.mxu2 }
  0xb1   : > { %v507_v25 = vpop.f32.mrf.mxu0 }
  0xb2   : > { %v550_v26 = vpop.f32.mrf.mxu1 }
  0xb3   : > { %v551_v27 = vadd.f32 %v550_v26, %v507_v25 }
  0xb5   : > { %v1252_v28 = vadd.f32 %v593_v17, %v551_v27 }
  0xb8   : > { %v532_v29 = vpop.f32.mrf.mxu3  ;;  %v601_v30 = vpop.f32.mrf.mxu2 }
  0xb9   : > { %v510_v31 = vpop.f32.mrf.mxu0 }
  0xba   : > { %v553_v32 = vpop.f32.mrf.mxu1 }
  0xbb   : > { %v554_v33 = vadd.f32 %v553_v32, %v510_v31 }
  0xbd   : > { %v1254_v34 = vadd.f32 %v596_v18, %v554_v33 }
  0xc0   : > { %v535_v35 = vpop.f32.mrf.mxu3  ;;  %v603_v36 = vpop.f32.mrf.mxu2 }
  0xc1   : > { %v512_v37 = vpop.f32.mrf.mxu0 }
  0xc2   : > { %v555_v38 = vpop.f32.mrf.mxu1 }
  0xc3   : > { %v556_v39 = vadd.f32 %v555_v38, %v512_v37 }
  0xc5   : > { %v1256_v40 = vadd.f32 %v598_v24, %v556_v39 }
  0xc8   : > { %v537_v41 = vpop.f32.mrf.mxu3  ;;  %v606_v42 = vpop.f32.mrf.mxu2 }
  0xc9   : > { %v515_v43 = vpop.f32.mrf.mxu0 }
  0xca   : > { %v558_v44 = vpop.f32.mrf.mxu1 }
  0xcb   : > { %v559_v45 = vadd.f32 %v558_v44, %v515_v43 }
  0xcd   : > { %v1258_v46 = vadd.f32 %v601_v30, %v559_v45 }
  0xd0   : > { %v573_v47 = vpop.f32.mrf.mxu3  ;;  %v608_v48 = vpop.f32.mrf.mxu2 }
  0xd1   : > { %v517_v49 = vpop.f32.mrf.mxu0  ;;  %v574_v1 = vadd.f32 %v573_v47, %v530_v23 }
  0xd2   : > { %v560_v50 = vpop.f32.mrf.mxu1 }
  0xd3   : > { %v561_v51 = vadd.f32 %v560_v50, %v517_v49 }
  0xd5   : > { %v1260_v52 = vadd.f32 %v603_v36, %v561_v51 }
  0xd8   : > { %v575_v53 = vpop.f32.mrf.mxu3  ;;  %v611_v54 = vpop.f32.mrf.mxu2 }
  0xd9   : > { %v520_v55 = vpop.f32.mrf.mxu0  ;;  %v576_v9 = vadd.f32 %v575_v53, %v532_v29 }
  0xda   : > { %v563_v56 = vpop.f32.mrf.mxu1 }
  0xdb   : > { %v564_v57 = vadd.f32 %v563_v56, %v520_v55 }
  0xdd   : > { %v1262_v58 = vadd.f32 %v606_v42, %v564_v57 }
  0xe0   : > { %v578_v59 = vpop.f32.mrf.mxu3  ;;  %v613_v60 = vpop.f32.mrf.mxu2 }
  0xe1   : > { %v522_v61 = vpop.f32.mrf.mxu0  ;;  %v579_v16 = vadd.f32 %v578_v59, %v535_v35 }
  0xe2   : > { %v565_v62 = vpop.f32.mrf.mxu1 }
  0xe3   : > { %v566_v63 = vadd.f32 %v565_v62, %v522_v61 }
  0xe5   : > { %v1264_v0 = vadd.f32 %v608_v48, %v566_v63 }
  0xe8   : > { %v616_v2 = vpop.f32.mrf.mxu2  ;;  %v580_v3 = vpop.f32.mrf.mxu3 }
  0xe9   : > { %v1266_v4 = vadd.f32 %v616_v2, %v574_v1  ;;  %v525_v5 = vpop.f32.mrf.mxu0 }
  0xea   : > { %v568_v6 = vpop.f32.mrf.mxu1 }
  0xeb   : > { %v569_v7 = vadd.f32 %v568_v6, %v525_v5 }
  0xed   : > { %v1268_v8 = vadd.f32 %v611_v54, %v569_v7 }
  0xf0   : > { %v618_v10 = vpop.f32.mrf.mxu2 }
  0xf1   : > { %v1270_v11 = vadd.f32 %v618_v10, %v576_v9  ;;  %v527_v12 = vpop.f32.mrf.mxu0 }
  0xf2   : > { %v570_v13 = vpop.f32.mrf.mxu1 }
  0xf3   : > { %v571_v14 = vadd.f32 %v570_v13, %v527_v12 }
  0xf5   : > { %v614_v15 = vadd.f32 %v613_v60, %v571_v14 }
  0xf8   : > { %v621_v17 = vpop.f32.mrf.mxu2 }
  0xf9   : > { %v1272_v18 = vadd.f32 %v621_v17, %v579_v16 }
  0xfc   : > { %628 = sbr.rel (%p991_p5) target bundleno = 271 (0x10f), region = 36 }
 0x100   : > { %v623_v19 = vpop.f32.mrf.mxu2 }
 0x101   : > { %vm629_vm1 = vcmask 523264   ;;  %vm642_vm2 = vcmask 517120  }
 0x102   : > { %630 = vst.msk [vmem:[#allocation2] sm:$0xff] %vm629_vm1, %v1250_v22 }
 0x103   : > { %631 = vst.msk [vmem:[#allocation2 + $0x8] sm:$0xff] %vm629_vm1, %v1252_v28 }
 0x104   : > { %632 = vst.msk [vmem:[#allocation2 + $0x10] sm:$0xff] %vm629_vm1, %v1254_v34 }
 0x105   : > { %633 = vst.msk [vmem:[#allocation2 + $0x18] sm:$0xff] %vm629_vm1, %v1256_v40 }
 0x106   : > { %634 = vst.msk [vmem:[#allocation2 + $0x20] sm:$0xff] %vm629_vm1, %v1258_v46 }
 0x107   : > { %635 = vst.msk [vmem:[#allocation2 + $0x28] sm:$0xff] %vm629_vm1, %v1260_v52 }
 0x108   : > { %636 = vst.msk [vmem:[#allocation2 + $0x30] sm:$0xff] %vm629_vm1, %v1262_v58 }
 0x109   : > { %637 = vst.msk [vmem:[#allocation2 + $0x38] sm:$0xff] %vm629_vm1, %v1264_v0 }
 0x10a   : > { %638 = vst.msk [vmem:[#allocation2 + $0x40] sm:$0xff] %vm629_vm1, %v1268_v8 }
 0x10b   : > { %639 = vst.msk [vmem:[#allocation2 + $0x48] sm:$0xff] %vm629_vm1, %v614_v15 }
 0x10c   : > { %640 = vst.msk [vmem:[#allocation2 + $0x50] sm:$0xff] %vm629_vm1, %v1266_v4 }
 0x10d   : > { %641 = vst.msk [vmem:[#allocation2 + $0x58] sm:$0xff] %vm629_vm1, %v1270_v11 }
 0x10e   : > { %643 = vst.msk [vmem:[#allocation2 + $0x60] sm:$0x3] %vm642_vm2, %v1272_v18 }
 0x10f PF: > { %p992_p6 = scmp.eq.s32.totalorder %s1090_s12, 0 }
 0x111   : > { %647 = sbr.rel (%p992_p6) target bundleno = 294 (0x126), region = 40 }
 0x116   : > { %v648_v20 = vld [vmem:[#allocation2] sm:$0xff]  ;;  %vm674_vm3 = vcmask 523264   ;;  %v649_v21 = vld [vmem:[#allocation2 + $0x8] sm:$0xff]  ;;  %v650_v23 = vld [vmem:[#allocation2 + $0x10] sm:$0xff]  ;;  %vm687_vm4 = vcmask 517120  }
 0x117   : > { %v661_v24 = vmax.f32 %v648_v20, %v1250_v22  ;;  %v662_v25 = vmax.f32 %v649_v21, %v1252_v28  ;;  %v663_v26 = vmax.f32 %v650_v23, %v1254_v34  ;;  %v651_v27 = vld [vmem:[#allocation2 + $0x18] sm:$0xff]  ;;  %v652_v29 = vld [vmem:[#allocation2 + $0x20] sm:$0xff]  ;;  %v653_v30 = vld [vmem:[#allocation2 + $0x28] sm:$0xff] }
 0x118   : > { %v664_v31 = vmax.f32 %v651_v27, %v1256_v40  ;;  %v654_v32 = vld [vmem:[#allocation2 + $0x30] sm:$0xff]  ;;  %v665_v33 = vmax.f32 %v652_v29, %v1258_v46  ;;  %v655_v35 = vld [vmem:[#allocation2 + $0x38] sm:$0xff]  ;;  %v666_v36 = vmax.f32 %v653_v30, %v1260_v52  ;;  %v656_v22 = vld [vmem:[#allocation2 + $0x40] sm:$0xff] }
 0x119   : > { %675 = vst.msk [vmem:[#allocation2] sm:$0xff] %vm674_vm3, %v661_v24  ;;  %v667_v28 = vmax.f32 %v654_v32, %v1262_v58  ;;  %v657_v34 = vld [vmem:[#allocation2 + $0x48] sm:$0xff]  ;;  %v668_v37 = vmax.f32 %v655_v35, %v1264_v0  ;;  %v658_v38 = vld [vmem:[#allocation2 + $0x50] sm:$0xff]  ;;  %v669_v39 = vmax.f32 %v656_v22, %v1268_v8  ;;  %v659_v40 = vld [vmem:[#allocation2 + $0x58] sm:$0xff] }
 0x11a   : > { %676 = vst.msk [vmem:[#allocation2 + $0x8] sm:$0xff] %vm674_vm3, %v662_v25  ;;  %v670_v41 = vmax.f32 %v657_v34, %v614_v15  ;;  %v660_v42 = vld [vmem:[#allocation2 + $0x60] sm:$0x3]  ;;  %v671_v43 = vmax.f32 %v658_v38, %v1266_v4  ;;  %v672_v44 = vmax.f32 %v659_v40, %v1270_v11 }
 0x11b   : > { %677 = vst.msk [vmem:[#allocation2 + $0x10] sm:$0xff] %vm674_vm3, %v663_v26  ;;  %v673_v45 = vmax.f32 %v660_v42, %v1272_v18 }
 0x11c   : > { %678 = vst.msk [vmem:[#allocation2 + $0x18] sm:$0xff] %vm674_vm3, %v664_v31 }
 0x11d   : > { %679 = vst.msk [vmem:[#allocation2 + $0x20] sm:$0xff] %vm674_vm3, %v665_v33 }
 0x11e   : > { %680 = vst.msk [vmem:[#allocation2 + $0x28] sm:$0xff] %vm674_vm3, %v666_v36 }
 0x11f   : > { %681 = vst.msk [vmem:[#allocation2 + $0x30] sm:$0xff] %vm674_vm3, %v667_v28 }
 0x120   : > { %682 = vst.msk [vmem:[#allocation2 + $0x38] sm:$0xff] %vm674_vm3, %v668_v37 }
 0x121   : > { %683 = vst.msk [vmem:[#allocation2 + $0x40] sm:$0xff] %vm674_vm3, %v669_v39 }
 0x122   : > { %684 = vst.msk [vmem:[#allocation2 + $0x48] sm:$0xff] %vm674_vm3, %v670_v41 }
 0x123   : > { %685 = vst.msk [vmem:[#allocation2 + $0x50] sm:$0xff] %vm674_vm3, %v671_v43 }
 0x124   : > { %686 = vst.msk [vmem:[#allocation2 + $0x58] sm:$0xff] %vm674_vm3, %v672_v44 }
 0x125   : > { %688 = vst.msk [vmem:[#allocation2 + $0x60] sm:$0x3] %vm687_vm4, %v673_v45 }
 0x126 PF: > { %p993_p7 = scmp.ne.s32.totalorder %s1090_s12, 3 }
 0x128   : > { %692 = sbr.rel (%p993_p7) target bundleno = 322 (0x142), region = 44 }
 0x12d   : > { %v693_v46 = vld [vmem:[#allocation2] sm:$0xff]  ;;  %v694_v48 = vld [vmem:[#allocation2 + $0x8] sm:$0xff]  ;;  %v695_v49 = vld [vmem:[#allocation2 + $0x10] sm:$0xff]  ;;  %vm749_vm5 = vcmask 519168   ;;  %vm762_vm6 = vcmask 516096  }
 0x12e   : > { %v1075_v47 = vld [vmem:[%s1378_s2] ss:$0 sm:$0xff]  ;;  %v696_v50 = vld [vmem:[#allocation2 + $0x18] sm:$0xff]  ;;  %v698_v56 = vld [vmem:[#allocation2 + $0x28] sm:$0xff] }
 0x12f   : > { %v710_v51 = vadd.f32 %v1075_v47, %v693_v46  ;;  %v711_v52 = vadd.f32 %v1075_v47, %v694_v48  ;;  %v712_v53 = vadd.f32 %v1075_v47, %v695_v49  ;;  %v713_v54 = vadd.f32 %v1075_v47, %v696_v50  ;;  %v697_v55 = vld [vmem:[#allocation2 + $0x20] sm:$0xff]  ;;  %v699_v57 = vld [vmem:[#allocation2 + $0x30] sm:$0xff]  ;;  %v700_v61 = vld [vmem:[#allocation2 + $0x38] sm:$0xff] }
 0x130   : > { %v714_v58 = vadd.f32 %v1075_v47, %v697_v55  ;;  %v715_v59 = vadd.f32 %v1075_v47, %v698_v56  ;;  %v716_v60 = vadd.f32 %v1075_v47, %v699_v57  ;;  %v701_v2 = vld [vmem:[#allocation2 + $0x40] sm:$0xff]  ;;  %v717_v5 = vadd.f32 %v1075_v47, %v700_v61  ;;  %v702_v6 = vld [vmem:[#allocation2 + $0x48] sm:$0xff]  ;;  %v703_v7 = vld [vmem:[#allocation2 + $0x50] sm:$0xff] }
 0x131   : > { %v723_v62 = vmax.f32 %v710_v51, 0.0  ;;  %v724_v63 = vmax.f32 %v711_v52, 0.0  ;;  %v725_v0 = vmax.f32 %v712_v53, 0.0  ;;  %v726_v1 = vmax.f32 %v713_v54, 0.0  ;;  %v704_v8 = vld [vmem:[#allocation2 + $0x58] sm:$0xff] }
 0x132   : > { %v727_v3 = vmax.f32 %v714_v58, 0.0  ;;  %v728_v4 = vmax.f32 %v715_v59, 0.0  ;;  %v729_v12 = vmax.f32 %v716_v60, 0.0  ;;  %v705_v13 = vld [vmem:[#allocation2 + $0x60] sm:$0x3]  ;;  %v730_v16 = vmax.f32 %v717_v5, 0.0 }
 0x133   : > { %v736_v9 = vpack.c.bf16 %v723_v62, %v723_v62  ;;  %v737_v10 = vpack.c.bf16 %v724_v63, %v724_v63  ;;  %v738_v11 = vpack.c.bf16 %v725_v0, %v725_v0  ;;  %v739_v14 = vpack.c.bf16 %v726_v1, %v726_v1 }
 0x134   : > { %v740_v15 = vpack.c.bf16 %v727_v3, %v727_v3  ;;  %v718_v17 = vadd.f32 %v1075_v47, %v701_v2  ;;  %v719_v18 = vadd.f32 %v1075_v47, %v702_v6  ;;  %v720_v19 = vadd.f32 %v1075_v47, %v703_v7 }
 0x135   : > { %750 = vst.msk [vmem:[%s1379_s3] sm:$0xf] %vm749_vm5, %v736_v9  ;;  %v721_v20 = vadd.f32 %v1075_v47, %v704_v8  ;;  %v741_v21 = vpack.c.bf16 %v728_v4, %v728_v4  ;;  %v722_v23 = vadd.f32 %v1075_v47, %v705_v13  ;;  %v742_v24 = vpack.c.bf16 %v729_v12, %v729_v12 }
 0x136   : > { %751 = vst.msk [vmem:[%s1379_s3 + $0x4] sm:$0xf] %vm749_vm5, %v737_v10  ;;  %v731_v25 = vmax.f32 %v718_v17, 0.0  ;;  %v732_v26 = vmax.f32 %v719_v18, 0.0  ;;  %v733_v27 = vmax.f32 %v720_v19, 0.0  ;;  %v743_v29 = vpack.c.bf16 %v730_v16, %v730_v16 }
 0x137   : > { %752 = vst.msk [vmem:[%s1379_s3 + $0x8] sm:$0xf] %vm749_vm5, %v738_v11  ;;  %v734_v30 = vmax.f32 %v721_v20, 0.0  ;;  %v735_v32 = vmax.f32 %v722_v23, 0.0 }
 0x138   : > { %753 = vst.msk [vmem:[%s1379_s3 + $0xc] sm:$0xf] %vm749_vm5, %v739_v14  ;;  %v744_v31 = vpack.c.bf16 %v731_v25, %v731_v25  ;;  %v745_v33 = vpack.c.bf16 %v732_v26, %v732_v26  ;;  %v746_v35 = vpack.c.bf16 %v733_v27, %v733_v27 }
 0x139   : > { %754 = vst.msk [vmem:[%s1379_s3 + $0x10] sm:$0xf] %vm749_vm5, %v740_v15  ;;  %v747_v36 = vpack.c.bf16 %v734_v30, %v734_v30  ;;  %v748_v22 = vpack.c.bf16 %v735_v32, %v735_v32 }
 0x13a   : > { %755 = vst.msk [vmem:[%s1379_s3 + $0x14] sm:$0xf] %vm749_vm5, %v741_v21 }
 0x13b   : > { %756 = vst.msk [vmem:[%s1379_s3 + $0x18] sm:$0xf] %vm749_vm5, %v742_v24 }
 0x13c   : > { %757 = vst.msk [vmem:[%s1379_s3 + $0x1c] sm:$0xf] %vm749_vm5, %v743_v29 }
 0x13d   : > { %758 = vst.msk [vmem:[%s1379_s3 + $0x20] sm:$0xf] %vm749_vm5, %v744_v31 }
 0x13e   : > { %759 = vst.msk [vmem:[%s1379_s3 + $0x24] sm:$0xf] %vm749_vm5, %v745_v33 }
 0x13f   : > { %760 = vst.msk [vmem:[%s1379_s3 + $0x28] sm:$0xf] %vm749_vm5, %v746_v35 }
 0x140   : > { %761 = vst.msk [vmem:[%s1379_s3 + $0x2c] sm:$0xf] %vm749_vm5, %v747_v36 }
 0x141   : > { %763 = vst.msk [vmem:[%s1379_s3 + $0x30] sm:$0x1] %vm762_vm6, %v748_v22 }
 0x142 PF: > { %s13_s14 = sadd.s32 1, %s1098_s14   ;;  %s1380_s12 = smov %s1094_s13 }
 0x143   : > { %p10_p8 = scmp.ge.s32.totalorder %s13_s14, 6   ;;  %s1381_s13 = smov %s1383_s15 }
 0x145   :  { %12 = sbr.rel (!%p10_p8) target bundleno = 2 (0x2), region = 74 }

// kernel: better_fashion_classifier.5
= control target key start
LH: loop header
LB: loop body
LE: loop exit
PB: predicated region body
PF: predicated region fallthrough
CT: control target
= control target key end

     0   :  { %s3755_s0 = inlined_call_operand.vmem [shape: bf16[2,3136], index: 0, kind: input, shape index: {}]   ;;  %s3756_s1 = inlined_call_operand.vmem [shape: bf16[3136,128], index: 1, kind: input, shape index: {}]   ;;  %s3757_s2 = inlined_call_operand.vmem [shape: f32[1,128], index: 2, kind: input, shape index: {}]   ;;  %s3758_s3 = inlined_call_operand.vmem [shape: f32[128,10], index: 3, kind: input, shape index: {}]   ;;  %s3759_s4 = inlined_call_operand.vmem [shape: f32[1,10], index: 4, kind: input, shape index: {}]   ;;  %s3760_s5 = inlined_call_operand.hbm [shape: f32[2,10], index: 5, kind: output, shape index: {}]  }
   0x1   :  { %v2834_v0 = vld [vmem:[%s3756_s1 + $0x38] sm:$0xff]  ;;  %v2833_v4 = vld [vmem:[%s3756_s1 + $0x30] sm:$0xff]  ;;  %v2832_v8 = vld [vmem:[%s3756_s1 + $0x28] sm:$0xff] }
   0x2   :  { %v2850_v1 = vld [vmem:[%s3756_s1 + $0xb8] sm:$0xff]  ;;  %1658 = vmatpush.bf16.msra.mxu0 %v2834_v0  ;;  %v2849_v5 = vld [vmem:[%s3756_s1 + $0xb0] sm:$0xff]  ;;  %v2848_v9 = vld [vmem:[%s3756_s1 + $0xa8] sm:$0xff] }
   0x3   :  { %v2858_v2 = vld [vmem:[%s3756_s1 + $0xf8] sm:$0xff]  ;;  %1684 = vmatpush.bf16.msra.mxu2 %v2850_v1  ;;  %v2857_v6 = vld [vmem:[%s3756_s1 + $0xf0] sm:$0xff]  ;;  %v2856_v10 = vld [vmem:[%s3756_s1 + $0xe8] sm:$0xff] }
   0x4   :  { %v2842_v3 = vld [vmem:[%s3756_s1 + $0x78] sm:$0xff]  ;;  %1697 = vmatpush.bf16.msra.mxu3 %v2858_v2  ;;  %v2841_v7 = vld [vmem:[%s3756_s1 + $0x70] sm:$0xff]  ;;  %v2840_v11 = vld [vmem:[%s3756_s1 + $0x68] sm:$0xff] }
   0x5   :  { %1671 = vmatpush.bf16.msra.mxu1 %v2842_v3  ;;  %v2831_v12 = vld [vmem:[%s3756_s1 + $0x20] sm:$0xff]  ;;  %v2830_v16 = vld [vmem:[%s3756_s1 + $0x18] sm:$0xff]  ;;  %v2829_v21 = vld [vmem:[%s3756_s1 + $0x10] sm:$0xff] }
   0x6   :  { %1659 = vmatpush.bf16.msra.mxu0 %v2833_v4  ;;  %v2847_v13 = vld [vmem:[%s3756_s1 + $0xa0] sm:$0xff]  ;;  %v2846_v17 = vld [vmem:[%s3756_s1 + $0x98] sm:$0xff]  ;;  %v2845_v22 = vld [vmem:[%s3756_s1 + $0x90] sm:$0xff] }
   0x7   :  { %1685 = vmatpush.bf16.msra.mxu2 %v2849_v5  ;;  %v2855_v14 = vld [vmem:[%s3756_s1 + $0xe0] sm:$0xff]  ;;  %v2854_v18 = vld [vmem:[%s3756_s1 + $0xd8] sm:$0xff]  ;;  %v2853_v23 = vld [vmem:[%s3756_s1 + $0xd0] sm:$0xff] }
   0x8   :  { %1698 = vmatpush.bf16.msra.mxu3 %v2857_v6  ;;  %v2839_v15 = vld [vmem:[%s3756_s1 + $0x60] sm:$0xff]  ;;  %v2838_v19 = vld [vmem:[%s3756_s1 + $0x58] sm:$0xff]  ;;  %v2837_v24 = vld [vmem:[%s3756_s1 + $0x50] sm:$0xff] }
   0x9   :  { %1672 = vmatpush.bf16.msra.mxu1 %v2841_v7  ;;  %v22_v20 = vld [vmem:[%s3755_s0] sm:$0xff] }
   0xa   :  { %1660 = vmatpush.bf16.msra.mxu0 %v2832_v8  ;;  %423 = vst [vmem:[#allocation1] ss:$9 sm:$0xff] %v22_v20 }
   0xb   :  { %1686 = vmatpush.bf16.msra.mxu2 %v2848_v9 }
   0xc   :  { %1699 = vmatpush.bf16.msra.mxu3 %v2856_v10 }
   0xd   :  { %1673 = vmatpush.bf16.msra.mxu1 %v2840_v11 }
   0xe   :  { %1661 = vmatpush.bf16.msra.mxu0 %v2831_v12 }
   0xf   :  { %1687 = vmatpush.bf16.msra.mxu2 %v2847_v13 }
  0x10   :  { %1700 = vmatpush.bf16.msra.mxu3 %v2855_v14 }
  0x11   :  { %1674 = vmatpush.bf16.msra.mxu1 %v2839_v15 }
  0x12   :  { %1662 = vmatpush.bf16.msra.mxu0 %v2830_v16 }
  0x13   :  { %1688 = vmatpush.bf16.msra.mxu2 %v2846_v17 }
  0x14   :  { %1701 = vmatpush.bf16.msra.mxu3 %v2854_v18 }
  0x15   :  { %1675 = vmatpush.bf16.msra.mxu1 %v2838_v19 }
  0x16   :  { %10 = vsyncpa [#allocation3], 0  ;;  %1663 = vmatpush.bf16.msra.mxu0 %v2829_v21  ;;  %v2828_v25 = vld [vmem:[%s3756_s1 + $0x8] sm:$0xff]  ;;  %v2827_v29 = vld [vmem:[%s3756_s1] sm:$0xff]  ;;  %vm1655_vm0 = vcmask 523264   ;;  %s3052_s20 = smov [#allocation2]  }
  0x17   :  { %1689 = vmatpush.bf16.msra.mxu2 %v2845_v22  ;;  %v2844_v26 = vld [vmem:[%s3756_s1 + $0x88] sm:$0xff]  ;;  %v2843_v30 = vld [vmem:[%s3756_s1 + $0x80] sm:$0xff]  ;;  %v2866_v32 = vld [vmem:[%s3756_s1 + $0x138] sm:$0xff]  ;;  %s2031_s21 = sshll.u32 %s3052_s20, 4  ;;  %vm2024_vm1 = vcmask 74752   ;;  %s2032_s21 = int_to_ptr.vmem [resolvable:$true] %s2031_s21 }
  0x18   :  { %1702 = vmatpush.bf16.msra.mxu3 %v2853_v23  ;;  %v2852_v27 = vld [vmem:[%s3756_s1 + $0xc8] sm:$0xff]  ;;  %v2851_v31 = vld [vmem:[%s3756_s1 + $0xc0] sm:$0xff]  ;;  %v2882_v33 = vld [vmem:[%s3756_s1 + $0x1b8] sm:$0xff] }
  0x19   :  { %1676 = vmatpush.bf16.msra.mxu1 %v2837_v24  ;;  %v2836_v28 = vld [vmem:[%s3756_s1 + $0x48] sm:$0xff]  ;;  %v2890_v34 = vld [vmem:[%s3756_s1 + $0x1f8] sm:$0xff]  ;;  %v2835_v35 = vld [vmem:[%s3756_s1 + $0x40] sm:$0xff] }
  0x1a   :  { %1664 = vmatpush.bf16.msra.mxu0 %v2828_v25  ;;  %v2874_v36 = vld [vmem:[%s3756_s1 + $0x178] sm:$0xff]  ;;  %v2865_v38 = vld [vmem:[%s3756_s1 + $0x130] sm:$0xff]  ;;  %v424_v39 = vld [vmem:[#allocation1] sm:$0xff] }
  0x1b   :  { %1690 = vmatpush.bf16.msra.mxu2 %v2844_v26  ;;  %v426_v37 = vld [vmem:[#allocation1 + $0x12] sm:$0xff]  ;;  %v427_v42 = vld [vmem:[#allocation1 + $0x1b] sm:$0xff]  ;;  %v425_v44 = vld [vmem:[#allocation1 + $0x9] sm:$0xff] }
  0x1c   :  { %1703 = vmatpush.bf16.msra.mxu3 %v2852_v27  ;;  %v2881_v40 = vld [vmem:[%s3756_s1 + $0x1b0] sm:$0xff]  ;;  %v2864_v45 = vld [vmem:[%s3756_s1 + $0x128] sm:$0xff]  ;;  %v431_v51 = vld [vmem:[#allocation1 + $0x3f] sm:$0xff] }
  0x1d   :  { %1677 = vmatpush.bf16.msra.mxu1 %v2836_v28  ;;  %v2889_v41 = vld [vmem:[%s3756_s1 + $0x1f0] sm:$0xff]  ;;  %v2880_v46 = vld [vmem:[%s3756_s1 + $0x1a8] sm:$0xff]  ;;  %v2863_v54 = vld [vmem:[%s3756_s1 + $0x120] sm:$0xff] }
  0x1e   :  { %1665 = vmatpush.bf16.msra.mxu0 %v2827_v29  ;;  %v2873_v43 = vld [vmem:[%s3756_s1 + $0x170] sm:$0xff]  ;;  %v2888_v47 = vld [vmem:[%s3756_s1 + $0x1e8] sm:$0xff]  ;;  %v2879_v55 = vld [vmem:[%s3756_s1 + $0x1a0] sm:$0xff] }
  0x1f   :  { %1691 = vmatpush.bf16.msra.mxu2 %v2843_v30  ;;  %v2872_v48 = vld [vmem:[%s3756_s1 + $0x168] sm:$0xff]  ;;  %v430_v49 = vld [vmem:[#allocation1 + $0x36] sm:$0xff]  ;;  %v2887_v56 = vld [vmem:[%s3756_s1 + $0x1e0] sm:$0xff] }
  0x20   :  { %1704 = vmatpush.bf16.msra.mxu3 %v2851_v31  ;;  %v428_v50 = vld [vmem:[#allocation1 + $0x24] sm:$0xff]  ;;  %v3221_v53 = vld [vmem:[#allocation1 + $0x2d] sm:$0xff]  ;;  %v2862_v58 = vld [vmem:[%s3756_s1 + $0x118] sm:$0xff] }
  0x21   :  { %1678 = vmatpush.bf16.msra.mxu1 %v2835_v35  ;;  %1666 = vmatmul.bf16.vlgmr.msra.gmra.mxu0 %v424_v39  ;;  %v23_v52 = vld [vmem:[%s3755_s0 + $0x8] sm:$0xff]  ;;  %v2871_v57 = vld [vmem:[%s3756_s1 + $0x160] sm:$0xff]  ;;  %v2878_v59 = vld [vmem:[%s3756_s1 + $0x198] sm:$0xff] }
  0x22   :  { %1710 = vmatpush.bf16.msrb.mxu0 %v2866_v32  ;;  %1692 = vmatmul.bf16.vlgmr.msra.gmra.mxu2 %v426_v37  ;;  %433 = vst [vmem:[#allocation1] ss:$9 sm:$0xff] %v23_v52  ;;  %v2886_v60 = vld [vmem:[%s3756_s1 + $0x1d8] sm:$0xff]  ;;  %v2861_v62 = vld [vmem:[%s3756_s1 + $0x110] sm:$0xff]  ;;  %v2860_v2 = vld [vmem:[%s3756_s1 + $0x108] sm:$0xff] }
  0x23   :  { %1736 = vmatpush.bf16.msrb.mxu2 %v2882_v33  ;;  %1705 = vmatmul.bf16.vlgmr.msra.gmra.mxu3 %v427_v42  ;;  %v2870_v61 = vld [vmem:[%s3756_s1 + $0x158] sm:$0xff]  ;;  %v2877_v63 = vld [vmem:[%s3756_s1 + $0x190] sm:$0xff]  ;;  %v2876_v3 = vld [vmem:[%s3756_s1 + $0x188] sm:$0xff] }
  0x24   :  { %1749 = vmatpush.bf16.msrb.mxu3 %v2890_v34  ;;  %1679 = vmatmul.bf16.vlgmr.msra.gmra.mxu1 %v425_v44  ;;  %v2885_v0 = vld [vmem:[%s3756_s1 + $0x1d0] sm:$0xff]  ;;  %v2884_v4 = vld [vmem:[%s3756_s1 + $0x1c8] sm:$0xff]  ;;  %v2859_v6 = vld [vmem:[%s3756_s1 + $0x100] sm:$0xff] }
  0x25   :  { %1723 = vmatpush.bf16.msrb.mxu1 %v2874_v36  ;;  %v2869_v1 = vld [vmem:[%s3756_s1 + $0x150] sm:$0xff]  ;;  %v2868_v5 = vld [vmem:[%s3756_s1 + $0x148] sm:$0xff]  ;;  %v2875_v7 = vld [vmem:[%s3756_s1 + $0x180] sm:$0xff] }
  0x26   :  { %1711 = vmatpush.bf16.msrb.mxu0 %v2865_v38  ;;  %v2883_v8 = vld [vmem:[%s3756_s1 + $0x1c0] sm:$0xff]  ;;  %v2898_v9 = vld [vmem:[%s3756_s1 + $0x238] sm:$0xff]  ;;  %v2897_v14 = vld [vmem:[%s3756_s1 + $0x230] sm:$0xff] }
  0x27   :  { %1737 = vmatpush.bf16.msrb.mxu2 %v2881_v40  ;;  %v2914_v10 = vld [vmem:[%s3756_s1 + $0x2b8] sm:$0xff]  ;;  %v2867_v12 = vld [vmem:[%s3756_s1 + $0x140] sm:$0xff]  ;;  %v2913_v15 = vld [vmem:[%s3756_s1 + $0x2b0] sm:$0xff] }
  0x28   :  { %1750 = vmatpush.bf16.msrb.mxu3 %v2889_v41  ;;  %v2922_v11 = vld [vmem:[%s3756_s1 + $0x2f8] sm:$0xff]  ;;  %v2921_v16 = vld [vmem:[%s3756_s1 + $0x2f0] sm:$0xff]  ;;  %v2896_v18 = vld [vmem:[%s3756_s1 + $0x228] sm:$0xff] }
  0x29   :  { %1724 = vmatpush.bf16.msrb.mxu1 %v2873_v43  ;;  %v2906_v13 = vld [vmem:[%s3756_s1 + $0x278] sm:$0xff]  ;;  %v2905_v17 = vld [vmem:[%s3756_s1 + $0x270] sm:$0xff]  ;;  %v2912_v19 = vld [vmem:[%s3756_s1 + $0x2a8] sm:$0xff] }
  0x2a   :  { %1712 = vmatpush.bf16.msrb.mxu0 %v2864_v45  ;;  %v2920_v20 = vld [vmem:[%s3756_s1 + $0x2e8] sm:$0xff]  ;;  %v2895_v22 = vld [vmem:[%s3756_s1 + $0x220] sm:$0xff]  ;;  %v2894_v26 = vld [vmem:[%s3756_s1 + $0x218] sm:$0xff] }
  0x2b   :  { %1738 = vmatpush.bf16.msrb.mxu2 %v2880_v46  ;;  %v2904_v21 = vld [vmem:[%s3756_s1 + $0x268] sm:$0xff]  ;;  %v2911_v23 = vld [vmem:[%s3756_s1 + $0x2a0] sm:$0xff]  ;;  %v2910_v27 = vld [vmem:[%s3756_s1 + $0x298] sm:$0xff] }
  0x2c   :  { %1751 = vmatpush.bf16.msrb.mxu3 %v2888_v47  ;;  %v2919_v24 = vld [vmem:[%s3756_s1 + $0x2e0] sm:$0xff]  ;;  %v2918_v28 = vld [vmem:[%s3756_s1 + $0x2d8] sm:$0xff]  ;;  %v2893_v30 = vld [vmem:[%s3756_s1 + $0x210] sm:$0xff] }
  0x2d   :  { %1725 = vmatpush.bf16.msrb.mxu1 %v2872_v48  ;;  %v2903_v25 = vld [vmem:[%s3756_s1 + $0x260] sm:$0xff]  ;;  %v2902_v29 = vld [vmem:[%s3756_s1 + $0x258] sm:$0xff]  ;;  %v2909_v31 = vld [vmem:[%s3756_s1 + $0x290] sm:$0xff] }
  0x2e   :  { %1713 = vmatpush.bf16.msrb.mxu0 %v2863_v54  ;;  %v2917_v32 = vld [vmem:[%s3756_s1 + $0x2d0] sm:$0xff]  ;;  %v2892_v34 = vld [vmem:[%s3756_s1 + $0x208] sm:$0xff]  ;;  %v2891_v38 = vld [vmem:[%s3756_s1 + $0x200] sm:$0xff] }
  0x2f   :  { %1739 = vmatpush.bf16.msrb.mxu2 %v2879_v55  ;;  %v2901_v33 = vld [vmem:[%s3756_s1 + $0x250] sm:$0xff]  ;;  %v2908_v35 = vld [vmem:[%s3756_s1 + $0x288] sm:$0xff]  ;;  %v2907_v39 = vld [vmem:[%s3756_s1 + $0x280] sm:$0xff] }
  0x30   :  { %1752 = vmatpush.bf16.msrb.mxu3 %v2887_v56  ;;  %v2916_v36 = vld [vmem:[%s3756_s1 + $0x2c8] sm:$0xff]  ;;  %v2915_v40 = vld [vmem:[%s3756_s1 + $0x2c0] sm:$0xff]  ;;  %v2930_v41 = vld [vmem:[%s3756_s1 + $0x338] sm:$0xff] }
  0x31   :  { %1726 = vmatpush.bf16.msrb.mxu1 %v2871_v57  ;;  %v2900_v37 = vld [vmem:[%s3756_s1 + $0x248] sm:$0xff]  ;;  %v2946_v42 = vld [vmem:[%s3756_s1 + $0x3b8] sm:$0xff]  ;;  %v2899_v44 = vld [vmem:[%s3756_s1 + $0x240] sm:$0xff] }
  0x32   :  { %1714 = vmatpush.bf16.msrb.mxu0 %v2862_v58  ;;  %v2954_v43 = vld [vmem:[%s3756_s1 + $0x3f8] sm:$0xff]  ;;  %v434_v45 = vld [vmem:[#allocation1] sm:$0xff]  ;;  %v2929_v48 = vld [vmem:[%s3756_s1 + $0x330] sm:$0xff] }
  0x33   :  { %1740 = vmatpush.bf16.msrb.mxu2 %v2878_v59  ;;  %v2938_v46 = vld [vmem:[%s3756_s1 + $0x378] sm:$0xff]  ;;  %v2953_v52 = vld [vmem:[%s3756_s1 + $0x3f0] sm:$0xff]  ;;  %v2928_v54 = vld [vmem:[%s3756_s1 + $0x328] sm:$0xff] }
  0x34   :  { %1753 = vmatpush.bf16.msrb.mxu3 %v2886_v60  ;;  %v436_v47 = vld [vmem:[#allocation1 + $0x12] sm:$0xff]  ;;  %v2944_v55 = vld [vmem:[%s3756_s1 + $0x3a8] sm:$0xff]  ;;  %v2927_v58 = vld [vmem:[%s3756_s1 + $0x320] sm:$0xff] }
  0x35   :  { %1727 = vmatpush.bf16.msrb.mxu1 %v2870_v61  ;;  %v2952_v56 = vld [vmem:[%s3756_s1 + $0x3e8] sm:$0xff]  ;;  %v2943_v59 = vld [vmem:[%s3756_s1 + $0x3a0] sm:$0xff] }
  0x36   :  { %1715 = vmatpush.bf16.msrb.mxu0 %v2861_v62  ;;  %v2936_v57 = vld [vmem:[%s3756_s1 + $0x368] sm:$0xff]  ;;  %v2951_v60 = vld [vmem:[%s3756_s1 + $0x3e0] sm:$0xff]  ;;  %v2926_v62 = vld [vmem:[%s3756_s1 + $0x318] sm:$0xff] }
  0x37   :  { %1741 = vmatpush.bf16.msrb.mxu2 %v2877_v63  ;;  %v2935_v61 = vld [vmem:[%s3756_s1 + $0x360] sm:$0xff]  ;;  %v2942_v63 = vld [vmem:[%s3756_s1 + $0x398] sm:$0xff] }
  0x38   :  { %1754 = vmatpush.bf16.msrb.mxu3 %v2885_v0  ;;  %v2950_v0 = vld [vmem:[%s3756_s1 + $0x3d8] sm:$0xff] }
  0x39   :  { %1728 = vmatpush.bf16.msrb.mxu1 %v2869_v1  ;;  %v2934_v1 = vld [vmem:[%s3756_s1 + $0x358] sm:$0xff] }
  0x3a   :  { %1716 = vmatpush.bf16.msrb.mxu0 %v2860_v2  ;;  %v2925_v2 = vld [vmem:[%s3756_s1 + $0x310] sm:$0xff] }
  0x3b   :  { %1742 = vmatpush.bf16.msrb.mxu2 %v2876_v3  ;;  %v2941_v3 = vld [vmem:[%s3756_s1 + $0x390] sm:$0xff] }
  0x3c   :  { %1755 = vmatpush.bf16.msrb.mxu3 %v2884_v4  ;;  %v2949_v4 = vld [vmem:[%s3756_s1 + $0x3d0] sm:$0xff] }
  0x3d   :  { %1729 = vmatpush.bf16.msrb.mxu1 %v2868_v5  ;;  %v2933_v5 = vld [vmem:[%s3756_s1 + $0x350] sm:$0xff] }
  0x3e   :  { %1717 = vmatpush.bf16.msrb.mxu0 %v2859_v6  ;;  %v2924_v6 = vld [vmem:[%s3756_s1 + $0x308] sm:$0xff] }
  0x3f   :  { %1743 = vmatpush.bf16.msrb.mxu2 %v2875_v7  ;;  %v2940_v7 = vld [vmem:[%s3756_s1 + $0x388] sm:$0xff] }
  0x40   :  { %1756 = vmatpush.bf16.msrb.mxu3 %v2883_v8  ;;  %v2948_v8 = vld [vmem:[%s3756_s1 + $0x3c8] sm:$0xff] }
  0x41   :  { %1730 = vmatpush.bf16.msrb.mxu1 %v2867_v12  ;;  %1718 = vmatmul.bf16.vlgmr.msrb.gmra.mxu0 %v428_v50  ;;  %v2945_v50 = vld [vmem:[%s3756_s1 + $0x3b0] sm:$0xff]  ;;  %v441_v12 = vld [vmem:[#allocation1 + $0x3f] sm:$0xff] }
  0x42   :  { %1762 = vmatpush.bf16.msra.mxu0 %v2898_v9  ;;  %1744 = vmatmul.bf16.vlgmr.msrb.gmra.mxu2 %v430_v49  ;;  %v437_v49 = vld [vmem:[#allocation1 + $0x1b] sm:$0xff]  ;;  %v438_v9 = vld [vmem:[#allocation1 + $0x24] sm:$0xff] }
  0x43   :  { %1788 = vmatpush.bf16.msra.mxu2 %v2914_v10  ;;  %1757 = vmatmul.bf16.vlgmr.msrb.gmra.mxu3 %v431_v51  ;;  %v435_v51 = vld [vmem:[#allocation1 + $0x9] sm:$0xff]  ;;  %v440_v10 = vld [vmem:[#allocation1 + $0x36] sm:$0xff] }
  0x44   :  { %1801 = vmatpush.bf16.msra.mxu3 %v2922_v11  ;;  %1731 = vmatmul.bf16.vlgmr.msrb.gmra.mxu1 %v3221_v53  ;;  %v2937_v53 = vld [vmem:[%s3756_s1 + $0x370] sm:$0xff] }
  0x45   :  { %1775 = vmatpush.bf16.msra.mxu1 %v2906_v13  ;;  %v439_v11 = vld [vmem:[#allocation1 + $0x2d] sm:$0xff] }
  0x46   :  { %1763 = vmatpush.bf16.msra.mxu0 %v2897_v14  ;;  %v24_v13 = vld [vmem:[%s3755_s0 + $0x10] sm:$0xff]  ;;  %v2932_v14 = vld [vmem:[%s3756_s1 + $0x348] sm:$0xff] }
  0x47   :  { %1789 = vmatpush.bf16.msra.mxu2 %v2913_v15  ;;  %443 = vst [vmem:[#allocation1] ss:$9 sm:$0xff] %v24_v13  ;;  %v2923_v15 = vld [vmem:[%s3756_s1 + $0x300] sm:$0xff] }
  0x48   :  { %1802 = vmatpush.bf16.msra.mxu3 %v2921_v16  ;;  %v2939_v16 = vld [vmem:[%s3756_s1 + $0x380] sm:$0xff] }
  0x49   :  { %1776 = vmatpush.bf16.msra.mxu1 %v2905_v17  ;;  %v2962_v17 = vld [vmem:[%s3756_s1 + $0x438] sm:$0xff] }
  0x4a   :  { %1764 = vmatpush.bf16.msra.mxu0 %v2896_v18  ;;  %v2947_v18 = vld [vmem:[%s3756_s1 + $0x3c0] sm:$0xff] }
  0x4b   :  { %1790 = vmatpush.bf16.msra.mxu2 %v2912_v19  ;;  %v2978_v19 = vld [vmem:[%s3756_s1 + $0x4b8] sm:$0xff] }
  0x4c   :  { %1803 = vmatpush.bf16.msra.mxu3 %v2920_v20  ;;  %v2986_v20 = vld [vmem:[%s3756_s1 + $0x4f8] sm:$0xff] }
  0x4d   :  { %1777 = vmatpush.bf16.msra.mxu1 %v2904_v21  ;;  %v2931_v21 = vld [vmem:[%s3756_s1 + $0x340] sm:$0xff] }
  0x4e   :  { %1765 = vmatpush.bf16.msra.mxu0 %v2895_v22  ;;  %v2970_v22 = vld [vmem:[%s3756_s1 + $0x478] sm:$0xff] }
  0x4f   :  { %1791 = vmatpush.bf16.msra.mxu2 %v2911_v23  ;;  %v2961_v23 = vld [vmem:[%s3756_s1 + $0x430] sm:$0xff] }
  0x50   :  { %1804 = vmatpush.bf16.msra.mxu3 %v2919_v24  ;;  %v2977_v24 = vld [vmem:[%s3756_s1 + $0x4b0] sm:$0xff] }
  0x51   :  { %1778 = vmatpush.bf16.msra.mxu1 %v2903_v25  ;;  %v2985_v25 = vld [vmem:[%s3756_s1 + $0x4f0] sm:$0xff] }
  0x52   :  { %1766 = vmatpush.bf16.msra.mxu0 %v2894_v26  ;;  %v2969_v26 = vld [vmem:[%s3756_s1 + $0x470] sm:$0xff] }
  0x53   :  { %1792 = vmatpush.bf16.msra.mxu2 %v2910_v27  ;;  %v2960_v27 = vld [vmem:[%s3756_s1 + $0x428] sm:$0xff] }
  0x54   :  { %1805 = vmatpush.bf16.msra.mxu3 %v2918_v28  ;;  %v2976_v28 = vld [vmem:[%s3756_s1 + $0x4a8] sm:$0xff] }
  0x55   :  { %1779 = vmatpush.bf16.msra.mxu1 %v2902_v29  ;;  %v2984_v29 = vld [vmem:[%s3756_s1 + $0x4e8] sm:$0xff] }
  0x56   :  { %1767 = vmatpush.bf16.msra.mxu0 %v2893_v30  ;;  %v2968_v30 = vld [vmem:[%s3756_s1 + $0x468] sm:$0xff] }
  0x57   :  { %1793 = vmatpush.bf16.msra.mxu2 %v2909_v31  ;;  %v2959_v31 = vld [vmem:[%s3756_s1 + $0x420] sm:$0xff] }
  0x58   :  { %1806 = vmatpush.bf16.msra.mxu3 %v2917_v32  ;;  %v2975_v32 = vld [vmem:[%s3756_s1 + $0x4a0] sm:$0xff] }
  0x59   :  { %1780 = vmatpush.bf16.msra.mxu1 %v2901_v33  ;;  %v2983_v33 = vld [vmem:[%s3756_s1 + $0x4e0] sm:$0xff] }
  0x5a   :  { %1768 = vmatpush.bf16.msra.mxu0 %v2892_v34  ;;  %v2967_v34 = vld [vmem:[%s3756_s1 + $0x460] sm:$0xff] }
  0x5b   :  { %1794 = vmatpush.bf16.msra.mxu2 %v2908_v35  ;;  %v2958_v35 = vld [vmem:[%s3756_s1 + $0x418] sm:$0xff] }
  0x5c   :  { %1807 = vmatpush.bf16.msra.mxu3 %v2916_v36  ;;  %v2974_v36 = vld [vmem:[%s3756_s1 + $0x498] sm:$0xff] }
  0x5d   :  { %1781 = vmatpush.bf16.msra.mxu1 %v2900_v37  ;;  %v2982_v37 = vld [vmem:[%s3756_s1 + $0x4d8] sm:$0xff] }
  0x5e   :  { %1769 = vmatpush.bf16.msra.mxu0 %v2891_v38  ;;  %v2966_v38 = vld [vmem:[%s3756_s1 + $0x458] sm:$0xff] }
  0x5f   :  { %1795 = vmatpush.bf16.msra.mxu2 %v2907_v39  ;;  %v2957_v39 = vld [vmem:[%s3756_s1 + $0x410] sm:$0xff] }
  0x60   :  { %1808 = vmatpush.bf16.msra.mxu3 %v2915_v40  ;;  %v2973_v40 = vld [vmem:[%s3756_s1 + $0x490] sm:$0xff] }
  0x61   :  { %1782 = vmatpush.bf16.msra.mxu1 %v2899_v44  ;;  %1770 = vmatmul.bf16.vlgmr.msra.gmra.mxu0 %v434_v45  ;;  %v2972_v44 = vld [vmem:[%s3756_s1 + $0x488] sm:$0xff] }
  0x62   :  { %1814 = vmatpush.bf16.msrb.mxu0 %v2930_v41  ;;  %1796 = vmatmul.bf16.vlgmr.msra.gmra.mxu2 %v436_v47  ;;  %v2981_v41 = vld [vmem:[%s3756_s1 + $0x4d0] sm:$0xff]  ;;  %v2980_v45 = vld [vmem:[%s3756_s1 + $0x4c8] sm:$0xff]  ;;  %v2955_v47 = vld [vmem:[%s3756_s1 + $0x400] sm:$0xff] }
  0x63   :  { %1840 = vmatpush.bf16.msrb.mxu2 %v2946_v42  ;;  %1809 = vmatmul.bf16.vlgmr.msra.gmra.mxu3 %v437_v49  ;;  %v2965_v42 = vld [vmem:[%s3756_s1 + $0x450] sm:$0xff]  ;;  %v2979_v49 = vld [vmem:[%s3756_s1 + $0x4c0] sm:$0xff] }
  0x64   :  { %1853 = vmatpush.bf16.msrb.mxu3 %v2954_v43  ;;  %1783 = vmatmul.bf16.vlgmr.msra.gmra.mxu1 %v435_v51  ;;  %v2956_v43 = vld [vmem:[%s3756_s1 + $0x408] sm:$0xff]  ;;  %v3010_v51 = vld [vmem:[%s3756_s1 + $0x5b8] sm:$0xff] }
  0x65   :  { %1827 = vmatpush.bf16.msrb.mxu1 %v2938_v46  ;;  %v2964_v46 = vld [vmem:[%s3756_s1 + $0x448] sm:$0xff] }
  0x66   :  { %1815 = vmatpush.bf16.msrb.mxu0 %v2929_v48  ;;  %v2971_v48 = vld [vmem:[%s3756_s1 + $0x480] sm:$0xff] }
  0x67   :  { %1841 = vmatpush.bf16.msrb.mxu2 %v2945_v50  ;;  %v2994_v50 = vld [vmem:[%s3756_s1 + $0x538] sm:$0xff] }
  0x68   :  { %1854 = vmatpush.bf16.msrb.mxu3 %v2953_v52  ;;  %v3018_v52 = vld [vmem:[%s3756_s1 + $0x5f8] sm:$0xff] }
  0x69   :  { %1828 = vmatpush.bf16.msrb.mxu1 %v2937_v53  ;;  %v2963_v53 = vld [vmem:[%s3756_s1 + $0x440] sm:$0xff] }
  0x6a   :  { %1816 = vmatpush.bf16.msrb.mxu0 %v2928_v54  ;;  %v444_v54 = vld [vmem:[#allocation1] sm:$0xff] }
  0x6b   :  { %1842 = vmatpush.bf16.msrb.mxu2 %v2944_v55  ;;  %v446_v55 = vld [vmem:[#allocation1 + $0x12] sm:$0xff] }
  0x6c   :  { %1855 = vmatpush.bf16.msrb.mxu3 %v2952_v56  ;;  %v3002_v56 = vld [vmem:[%s3756_s1 + $0x578] sm:$0xff] }
  0x6d   :  { %1829 = vmatpush.bf16.msrb.mxu1 %v2936_v57  ;;  %v447_v57 = vld [vmem:[#allocation1 + $0x1b] sm:$0xff] }
  0x6e   :  { %1817 = vmatpush.bf16.msrb.mxu0 %v2927_v58  ;;  %v2993_v58 = vld [vmem:[%s3756_s1 + $0x530] sm:$0xff] }
  0x6f   :  { %1843 = vmatpush.bf16.msrb.mxu2 %v2943_v59  ;;  %v445_v59 = vld [vmem:[#allocation1 + $0x9] sm:$0xff] }
  0x70   :  { %1856 = vmatpush.bf16.msrb.mxu3 %v2951_v60  ;;  %v3009_v60 = vld [vmem:[%s3756_s1 + $0x5b0] sm:$0xff] }
  0x71   :  { %1830 = vmatpush.bf16.msrb.mxu1 %v2935_v61  ;;  %v3017_v61 = vld [vmem:[%s3756_s1 + $0x5f0] sm:$0xff] }
  0x72   :  { %1818 = vmatpush.bf16.msrb.mxu0 %v2926_v62  ;;  %v3001_v62 = vld [vmem:[%s3756_s1 + $0x570] sm:$0xff] }
  0x73   :  { %1844 = vmatpush.bf16.msrb.mxu2 %v2942_v63  ;;  %v2992_v63 = vld [vmem:[%s3756_s1 + $0x528] sm:$0xff] }
  0x74   :  { %1857 = vmatpush.bf16.msrb.mxu3 %v2950_v0  ;;  %v3008_v0 = vld [vmem:[%s3756_s1 + $0x5a8] sm:$0xff] }
  0x75   :  { %1831 = vmatpush.bf16.msrb.mxu1 %v2934_v1  ;;  %v3016_v1 = vld [vmem:[%s3756_s1 + $0x5e8] sm:$0xff] }
  0x76   :  { %1819 = vmatpush.bf16.msrb.mxu0 %v2925_v2  ;;  %v3000_v2 = vld [vmem:[%s3756_s1 + $0x568] sm:$0xff] }
  0x77   :  { %1845 = vmatpush.bf16.msrb.mxu2 %v2941_v3  ;;  %v3024_v3 = vld [vmem:[%s3757_s2] ss:$0 sm:$0xff]  ;;  %s2033_s2 = sshll.u32 %s3760_s5, 4  ;;  %s2034_s2 = int_to_ptr.hbm [resolvable:$true] %s2033_s2 }
  0x78   :  { %1858 = vmatpush.bf16.msrb.mxu3 %v2949_v4  ;;  %v3614_v4 = vld [vmem:[#allocation1 + $0x24] sm:$0xff] }
  0x79   :  { %1832 = vmatpush.bf16.msrb.mxu1 %v2933_v5  ;;  %v3616_v5 = vld [vmem:[#allocation1 + $0x36] sm:$0xff] }
  0x7a   :  { %1820 = vmatpush.bf16.msrb.mxu0 %v2924_v6  ;;  %v3618_v6 = vld [vmem:[#allocation1 + $0x3f] sm:$0xff] }
  0x7b   :  { %1846 = vmatpush.bf16.msrb.mxu2 %v2940_v7  ;;  %v3620_v7 = vld [vmem:[#allocation1 + $0x2d] sm:$0xff] }
  0x7c   :  { %1859 = vmatpush.bf16.msrb.mxu3 %v2948_v8  ;;  %v25_v8 = vld [vmem:[%s3755_s0 + $0x18] sm:$0x1] }
  0x7d   :  { %1833 = vmatpush.bf16.msrb.mxu1 %v2932_v14  ;;  %453 = vst [vmem:[#allocation1] ss:$9 sm:$0xff] %v25_v8  ;;  %v2999_v14 = vld [vmem:[%s3756_s1 + $0x560] sm:$0xff] }
  0x7e   :  { %1821 = vmatpush.bf16.msrb.mxu0 %v2923_v15  ;;  %v2990_v15 = vld [vmem:[%s3756_s1 + $0x518] sm:$0xff] }
  0x7f   :  { %1847 = vmatpush.bf16.msrb.mxu2 %v2939_v16 }
  0x80   :  { %1860 = vmatpush.bf16.msrb.mxu3 %v2947_v18  ;;  %v3014_v18 = vld [vmem:[%s3756_s1 + $0x5d8] sm:$0xff] }
  0x81   :  { %1834 = vmatpush.bf16.msrb.mxu1 %v2931_v21  ;;  %1822 = vmatmul.bf16.vlgmr.msrb.gmra.mxu0 %v438_v9  ;;  %v2991_v9 = vld [vmem:[%s3756_s1 + $0x520] sm:$0xff]  ;;  %v2998_v21 = vld [vmem:[%s3756_s1 + $0x558] sm:$0xff] }
  0x82   :  { %1866 = vmatpush.bf16.msra.mxu0 %v2962_v17  ;;  %1848 = vmatmul.bf16.vlgmr.msrb.gmra.mxu2 %v440_v10  ;;  %v3007_v10 = vld [vmem:[%s3756_s1 + $0x5a0] sm:$0xff]  ;;  %v3006_v17 = vld [vmem:[%s3756_s1 + $0x598] sm:$0xff] }
  0x83   :  { %1892 = vmatpush.bf16.msra.mxu2 %v2978_v19  ;;  %1861 = vmatmul.bf16.vlgmr.msrb.gmra.mxu3 %v441_v12 }
  0x84   :  { %1905 = vmatpush.bf16.msra.mxu3 %v2986_v20  ;;  %1835 = vmatmul.bf16.vlgmr.msrb.gmra.mxu1 %v439_v11  ;;  %v3015_v11 = vld [vmem:[%s3756_s1 + $0x5e0] sm:$0xff] }
  0x85   :  { %1879 = vmatpush.bf16.msra.mxu1 %v2970_v22 }
  0x86   :  { %1867 = vmatpush.bf16.msra.mxu0 %v2961_v23  ;;  %v2989_v23 = vld [vmem:[%s3756_s1 + $0x510] sm:$0xff] }
  0x87   :  { %1893 = vmatpush.bf16.msra.mxu2 %v2977_v24 }
  0x88   :  { %1906 = vmatpush.bf16.msra.mxu3 %v2985_v25  ;;  %v3005_v25 = vld [vmem:[%s3756_s1 + $0x590] sm:$0xff] }
  0x89   :  { %1880 = vmatpush.bf16.msra.mxu1 %v2969_v26  ;;  %v3013_v26 = vld [vmem:[%s3756_s1 + $0x5d0] sm:$0xff] }
  0x8a   :  { %1868 = vmatpush.bf16.msra.mxu0 %v2960_v27 }
  0x8b   :  { %1894 = vmatpush.bf16.msra.mxu2 %v2976_v28 }
  0x8c   :  { %1907 = vmatpush.bf16.msra.mxu3 %v2984_v29  ;;  %v2997_v29 = vld [vmem:[%s3756_s1 + $0x550] sm:$0xff] }
  0x8d   :  { %1881 = vmatpush.bf16.msra.mxu1 %v2968_v30  ;;  %v2988_v30 = vld [vmem:[%s3756_s1 + $0x508] sm:$0xff] }
  0x8e   :  { %1869 = vmatpush.bf16.msra.mxu0 %v2959_v31 }
  0x8f   :  { %1895 = vmatpush.bf16.msra.mxu2 %v2975_v32  ;;  %v3004_v32 = vld [vmem:[%s3756_s1 + $0x588] sm:$0xff] }
  0x90   :  { %1908 = vmatpush.bf16.msra.mxu3 %v2983_v33  ;;  %v3012_v33 = vld [vmem:[%s3756_s1 + $0x5c8] sm:$0xff] }
  0x91   :  { %1882 = vmatpush.bf16.msra.mxu1 %v2967_v34 }
  0x92   :  { %1870 = vmatpush.bf16.msra.mxu0 %v2958_v35  ;;  %v2996_v35 = vld [vmem:[%s3756_s1 + $0x548] sm:$0xff] }
  0x93   :  { %1896 = vmatpush.bf16.msra.mxu2 %v2974_v36  ;;  %v2987_v36 = vld [vmem:[%s3756_s1 + $0x500] sm:$0xff] }
  0x94   :  { %1909 = vmatpush.bf16.msra.mxu3 %v2982_v37 }
  0x95   :  { %1883 = vmatpush.bf16.msra.mxu1 %v2966_v38  ;;  %v3003_v38 = vld [vmem:[%s3756_s1 + $0x580] sm:$0xff] }
  0x96   :  { %1871 = vmatpush.bf16.msra.mxu0 %v2957_v39  ;;  %v3011_v39 = vld [vmem:[%s3756_s1 + $0x5c0] sm:$0xff] }
  0x97   :  { %1897 = vmatpush.bf16.msra.mxu2 %v2973_v40  ;;  %v3022_v40 = vld [vmem:[%s3756_s1 + $0x618] sm:$0xff] }
  0x98   :  { %1910 = vmatpush.bf16.msra.mxu3 %v2981_v41  ;;  %v2995_v41 = vld [vmem:[%s3756_s1 + $0x540] sm:$0xff] }
  0x99   :  { %1884 = vmatpush.bf16.msra.mxu1 %v2965_v42  ;;  %v3021_v42 = vld [vmem:[%s3756_s1 + $0x610] sm:$0xff] }
  0x9a   :  { %1872 = vmatpush.bf16.msra.mxu0 %v2956_v43  ;;  %v3020_v43 = vld [vmem:[%s3756_s1 + $0x608] sm:$0xff] }
  0x9b   :  { %1898 = vmatpush.bf16.msra.mxu2 %v2972_v44  ;;  %v3019_v44 = vld [vmem:[%s3756_s1 + $0x600] sm:$0xff] }
  0x9c   :  { %1911 = vmatpush.bf16.msra.mxu3 %v2980_v45 }
  0x9d   :  { %1885 = vmatpush.bf16.msra.mxu1 %v2964_v46 }
  0x9e   :  { %1873 = vmatpush.bf16.msra.mxu0 %v2955_v47  ;;  %v1667_v12 = vpop.f32.mrf.mxu0 }
  0x9f   :  { %1899 = vmatpush.bf16.msra.mxu2 %v2971_v48  ;;  %v1668_v13 = vadd.f32 %v3024_v3, %v1667_v12 }
  0xa0   :  { %1912 = vmatpush.bf16.msra.mxu3 %v2979_v49  ;;  %v454_v49 = vld [vmem:[#allocation1] sm:$0xff] }
  0xa1   :  { %1886 = vmatpush.bf16.msra.mxu1 %v2963_v53  ;;  %1874 = vmatmul.bf16.vlgmr.msra.gmra.mxu0 %v444_v54  ;;  %v1680_v16 = vpop.f32.mrf.mxu1 }
  0xa2   :  { %1918 = vmatpush.bf16.msrb.mxu0 %v2994_v50  ;;  %1900 = vmatmul.bf16.vlgmr.msra.gmra.mxu2 %v446_v55  ;;  %v1681_v19 = vadd.f32 %v1680_v16, %v1668_v13  ;;  %v1997_v13 = vld [vmem:[%s3758_s3 + $0x68] sm:$0xff]  ;;  %v1995_v16 = vld [vmem:[%s3758_s3 + $0x58] sm:$0xff] }
  0xa3   :  { %1944 = vmatpush.bf16.msrb.mxu2 %v3010_v51  ;;  %1913 = vmatmul.bf16.vlgmr.msra.gmra.mxu3 %v447_v57 }
  0xa4   :  { %1957 = vmatpush.bf16.msrb.mxu3 %v3018_v52  ;;  %1887 = vmatmul.bf16.vlgmr.msra.gmra.mxu1 %v445_v59 }
  0xa5   :  { %1931 = vmatpush.bf16.msrb.mxu1 %v3002_v56  ;;  %v1693_v20 = vpop.f32.mrf.mxu2 }
  0xa6   :  { %1919 = vmatpush.bf16.msrb.mxu0 %v2993_v58  ;;  %v1694_v22 = vadd.f32 %v1693_v20, %v1681_v19  ;;  %v1706_v24 = vpop.f32.mrf.mxu3  ;;  %v1669_v28 = vpop.f32.mrf.mxu0  ;;  %v1994_v19 = vld [vmem:[%s3758_s3 + $0x50] sm:$0xff]  ;;  %v1993_v20 = vld [vmem:[%s3758_s3 + $0x48] sm:$0xff] }
  0xa7   :  { %1945 = vmatpush.bf16.msrb.mxu2 %v3009_v60  ;;  %v1989_v28 = vld [vmem:[%s3758_s3 + $0x28] sm:$0xff] }
  0xa8   :  { %1958 = vmatpush.bf16.msrb.mxu3 %v3017_v61  ;;  %v1707_v27 = vadd.f32 %v1706_v24, %v1694_v22  ;;  %v1992_v22 = vld [vmem:[%s3758_s3 + $0x40] sm:$0xff]  ;;  %v1991_v24 = vld [vmem:[%s3758_s3 + $0x38] sm:$0xff] }
  0xa9   :  { %1932 = vmatpush.bf16.msrb.mxu1 %v3001_v62  ;;  %v1682_v31 = vpop.f32.mrf.mxu1 }
  0xaa   :  { %1920 = vmatpush.bf16.msrb.mxu0 %v2992_v63 }
  0xab   :  { %1946 = vmatpush.bf16.msrb.mxu2 %v3008_v0 }
  0xac   :  { %1959 = vmatpush.bf16.msrb.mxu3 %v3016_v1 }
  0xad   :  { %1933 = vmatpush.bf16.msrb.mxu1 %v3000_v2  ;;  %v1695_v34 = vpop.f32.mrf.mxu2 }
  0xae   :  { %1921 = vmatpush.bf16.msrb.mxu0 %v2991_v9  ;;  %v1708_v37 = vpop.f32.mrf.mxu3  ;;  %v1986_v34 = vld [vmem:[%s3758_s3 + $0x10] sm:$0xff] }
  0xaf   :  { %1947 = vmatpush.bf16.msrb.mxu2 %v3007_v10  ;;  %v1999_v10 = vld [vmem:[%s3758_s3 + $0x78] sm:$0xff] }
  0xb0   :  { %1960 = vmatpush.bf16.msrb.mxu3 %v3015_v11  ;;  %v1998_v11 = vld [vmem:[%s3758_s3 + $0x70] sm:$0xff] }
  0xb1   :  { %1934 = vmatpush.bf16.msrb.mxu1 %v2999_v14 }
  0xb2   :  { %1922 = vmatpush.bf16.msrb.mxu0 %v2990_v15  ;;  %v1996_v15 = vld [vmem:[%s3758_s3 + $0x60] sm:$0xff] }
  0xb3   :  { %1948 = vmatpush.bf16.msrb.mxu2 %v3006_v17 }
  0xb4   :  { %1961 = vmatpush.bf16.msrb.mxu3 %v3014_v18 }
  0xb5   :  { %1935 = vmatpush.bf16.msrb.mxu1 %v2998_v21 }
  0xb6   :  { %1923 = vmatpush.bf16.msrb.mxu0 %v2989_v23 }
  0xb7   :  { %1949 = vmatpush.bf16.msrb.mxu2 %v3005_v25  ;;  %v1990_v25 = vld [vmem:[%s3758_s3 + $0x30] sm:$0xff] }
  0xb8   :  { %1962 = vmatpush.bf16.msrb.mxu3 %v3013_v26 }
  0xb9   :  { %1936 = vmatpush.bf16.msrb.mxu1 %v2997_v29 }
  0xba   :  { %1924 = vmatpush.bf16.msrb.mxu0 %v2988_v30  ;;  %v1988_v30 = vld [vmem:[%s3758_s3 + $0x20] sm:$0xff] }
  0xbb   :  { %1950 = vmatpush.bf16.msrb.mxu2 %v3004_v32 }
  0xbc   :  { %1963 = vmatpush.bf16.msrb.mxu3 %v3012_v33  ;;  %v1987_v33 = vld [vmem:[%s3758_s3 + $0x18] sm:$0xff] }
  0xbd   :  { %1937 = vmatpush.bf16.msrb.mxu1 %v2996_v35 }
  0xbe   :  { %1925 = vmatpush.bf16.msrb.mxu0 %v2987_v36  ;;  %v1719_v45 = vpop.f32.mrf.mxu0 }
  0xbf   :  { %1951 = vmatpush.bf16.msrb.mxu2 %v3003_v38  ;;  %v1720_v46 = vadd.f32 %v1719_v45, %v1707_v27  ;;  %v1985_v38 = vld [vmem:[%s3758_s3 + $0x8] sm:$0xff] }
  0xc0   :  { %1964 = vmatpush.bf16.msrb.mxu3 %v3011_v39 }
  0xc1   :  { %1938 = vmatpush.bf16.msrb.mxu1 %v2995_v41  ;;  %1926 = vmatmul.bf16.vlgmr.msrb.gmra.mxu0 %v3614_v4  ;;  %v1732_v47 = vpop.f32.mrf.mxu1 }
  0xc2   :  { %1974 = vmatpush.bf16.msra.mxu0 %v3022_v40  ;;  %1952 = vmatmul.bf16.vlgmr.msrb.gmra.mxu2 %v3616_v5  ;;  %v1733_v48 = vadd.f32 %v1732_v47, %v1720_v46  ;;  %v1984_v40 = vld [vmem:[%s3758_s3] sm:$0xff] }
  0xc3   :  { %1965 = vmatmul.bf16.vlgmr.msrb.gmra.mxu3 %v3618_v6 }
  0xc4   :  { %1939 = vmatmul.bf16.vlgmr.msrb.gmra.mxu1 %v3620_v7 }
  0xc5   :  { %v1745_v50 = vpop.f32.mrf.mxu2  ;;  %2004 = vmatpush.msra.mxu1 %v1999_v10 }
  0xc6   :  { %1975 = vmatpush.bf16.msra.mxu0 %v3021_v42  ;;  %v1746_v51 = vadd.f32 %v1745_v50, %v1733_v48  ;;  %v1758_v52 = vpop.f32.mrf.mxu3  ;;  %v1721_v54 = vpop.f32.mrf.mxu0 }
  0xc7   :  { %2005 = vmatpush.msra.mxu1 %v1998_v11 }
  0xc8   :  { %v1759_v53 = vadd.f32 %v1758_v52, %v1746_v51 }
  0xc9   :  { %v1734_v55 = vpop.f32.mrf.mxu1  ;;  %2006 = vmatpush.msra.mxu1 %v1997_v13 }
  0xca   :  { %1976 = vmatpush.bf16.msra.mxu0 %v3020_v43 }
  0xcb   :  { %2007 = vmatpush.msra.mxu1 %v1996_v15 }
  0xcd   :  { %v1747_v56 = vpop.f32.mrf.mxu2  ;;  %2008 = vmatpush.msra.mxu1 %v1995_v16 }
  0xce   :  { %1977 = vmatpush.bf16.msra.mxu0 %v3019_v44  ;;  %v1760_v57 = vpop.f32.mrf.mxu3 }
  0xcf   :  { %2009 = vmatpush.msra.mxu1 %v1994_v19 }
  0xd1   :  { %2826 = vmatmul.msk.bf16.vlgmr.msra.gmra.mxu0 %vm1655_vm0, %v454_v49  ;;  %2010 = vmatpush.msra.mxu1 %v1993_v20 }
  0xd3   :  { %2011 = vmatpush.msra.mxu1 %v1992_v22 }
  0xd5   :  { %2012 = vmatpush.msra.mxu1 %v1991_v24 }
  0xd7   :  { %2013 = vmatpush.msra.mxu1 %v1990_v25 }
  0xd9   :  { %2014 = vmatpush.msra.mxu1 %v1989_v28 }
  0xdb   :  { %2015 = vmatpush.msra.mxu1 %v1988_v30 }
  0xdd   :  { %2016 = vmatpush.msra.mxu1 %v1987_v33 }
  0xde   :  { %v1771_v58 = vpop.f32.mrf.mxu0 }
  0xdf   :  { %v1772_v59 = vadd.f32 %v1771_v58, %v1759_v53  ;;  %2017 = vmatpush.msra.mxu1 %v1986_v34 }
  0xe1   :  { %v1784_v60 = vpop.f32.mrf.mxu1  ;;  %2018 = vmatpush.msra.mxu1 %v1985_v38 }
  0xe2   :  { %v1785_v61 = vadd.f32 %v1784_v60, %v1772_v59 }
  0xe3   :  { %2019 = vmatpush.msra.mxu1 %v1984_v40 }
  0xe5   :  { %v1797_v62 = vpop.f32.mrf.mxu2 }
  0xe6   :  { %v1798_v63 = vadd.f32 %v1797_v62, %v1785_v61  ;;  %v1810_v0 = vpop.f32.mrf.mxu3  ;;  %v1773_v1 = vpop.f32.mrf.mxu0  ;;  %v3025_v62 = vld [vmem:[%s3759_s4] ss:$0 sm:$0xff] }
  0xe8   :  { %v1811_v2 = vadd.f32 %v1810_v0, %v1798_v63 }
  0xe9   :  { %v1786_v3 = vpop.f32.mrf.mxu1 }
  0xed   :  { %v1799_v4 = vpop.f32.mrf.mxu2 }
  0xee   :  { %v1812_v5 = vpop.f32.mrf.mxu3 }
  0xfe   :  { %v1823_v6 = vpop.f32.mrf.mxu0 }
  0xff   :  { %v1824_v31 = vadd.f32 %v1823_v6, %v1811_v2 }
 0x101   :  { %v1836_v7 = vpop.f32.mrf.mxu1 }
 0x102   :  { %v1837_v35 = vadd.f32 %v1836_v7, %v1824_v31 }
 0x105   :  { %v1849_v8 = vpop.f32.mrf.mxu2 }
 0x106   :  { %v1862_v9 = vpop.f32.mrf.mxu3  ;;  %v1825_v12 = vpop.f32.mrf.mxu0  ;;  %v1850_v39 = vadd.f32 %v1849_v8, %v1837_v35 }
 0x108   :  { %v1863_v41 = vadd.f32 %v1862_v9, %v1850_v39 }
 0x109   :  { %v1838_v14 = vpop.f32.mrf.mxu1 }
 0x10d   :  { %v1851_v17 = vpop.f32.mrf.mxu2 }
 0x10e   :  { %v1864_v18 = vpop.f32.mrf.mxu3 }
 0x11e   :  { %v1875_v21 = vpop.f32.mrf.mxu0 }
 0x11f   :  { %v1876_v42 = vadd.f32 %v1875_v21, %v1863_v41 }
 0x121   :  { %v1888_v23 = vpop.f32.mrf.mxu1 }
 0x122   :  { %v1889_v43 = vadd.f32 %v1888_v23, %v1876_v42 }
 0x125   :  { %v1901_v26 = vpop.f32.mrf.mxu2 }
 0x126   :  { %v1914_v27 = vpop.f32.mrf.mxu3  ;;  %v1877_v29 = vpop.f32.mrf.mxu0  ;;  %v1902_v44 = vadd.f32 %v1901_v26, %v1889_v43 }
 0x128   :  { %v1915_v46 = vadd.f32 %v1914_v27, %v1902_v44 }
 0x129   :  { %v1890_v32 = vpop.f32.mrf.mxu1 }
 0x12d   :  { %v1903_v36 = vpop.f32.mrf.mxu2 }
 0x12e   :  { %v1916_v37 = vpop.f32.mrf.mxu3 }
 0x13e   :  { %v1927_v45 = vpop.f32.mrf.mxu0 }
 0x13f   :  { %v1928_v48 = vadd.f32 %v1927_v45, %v1915_v46 }
 0x141   :  { %v1940_v47 = vpop.f32.mrf.mxu1 }
 0x142   :  { %v1941_v52 = vadd.f32 %v1940_v47, %v1928_v48 }
 0x145   :  { %v1953_v49 = vpop.f32.mrf.mxu2 }
 0x146   :  { %v1966_v50 = vpop.f32.mrf.mxu3  ;;  %v1929_v51 = vpop.f32.mrf.mxu0  ;;  %v1954_v53 = vadd.f32 %v1953_v49, %v1941_v52 }
 0x148   :  { %v1967_v55 = vadd.f32 %v1966_v50, %v1954_v53 }
 0x149   :  { %v1942_v54 = vpop.f32.mrf.mxu1 }
 0x14d   :  { %v1955_v56 = vpop.f32.mrf.mxu2 }
 0x14e   :  { %v1968_v57 = vpop.f32.mrf.mxu3  ;;  %v1979_v58 = vpop.f32.mrf.mxu0 }
 0x14f   :  { %v1980_v59 = vadd.f32 %v1979_v58, %v1967_v55 }
 0x151   :  { %v1983_v60 = vmax.f32 %v1980_v59, 0.0 }
 0x153   :  { %2020 = vmatmul.f32.vlgmr.msra.gmra.mxu1 %v1983_v60 }
 0x156   :  { %v1981_v61 = vpop.f32.mrf.mxu0 }
 0x1d0   :  { %v2021_v63 = vpop.f32.mrf.mxu1 }
 0x1d1   :  { %v2022_v0 = vadd.f32 %v3025_v62, %v2021_v63 }
 0x1d3   :  { %2025 = vst.msk [vmem:[#allocation2] sm:$0x3] %vm2024_vm1, %v2022_v0 }
 0x1d4   :  { %2036 = dma.vmem_to_hbm [thread:$0]  %s2032_s21, 32, %s2034_s2, [#allocation3]  }
 0x1d5   :  { %3050 = dma.done.wait [#allocation3], 32  }
 0x1d6   :  { %3051 = vsyncadd [#allocation3], 4294967264 }
 0x1d7   :  { %2041 = vsyncpa [#allocation3], 1 }

</bundles_post_ra>
